<compile_context>
chip_gen: v6e
topology: v6e:2x2x1
jax: 0.10.0
libtpu: 0.0.40
codegen_flags: <defaults>
</compile_context>

<pallas_src>
import functools

import jax
import jax.numpy as jnp
import numpy as np
from jax.experimental import pallas as pl
from jax.experimental.pallas import tpu as pltpu

LANE = 128
MXU_DTYPE = jnp.bfloat16          # MXU inputs; accumulation stays f32.
EPS = 1e-5


def _cparams():
    return pltpu.CompilerParams(
        dimension_semantics=("parallel",),
        vmem_limit_bytes=32 * 1024 * 1024,   # explicit, fits v5e/v6e/v7x
    )


# ----------------------------- Pallas kernels -------------------------------

def up_kernel(x_ref, w_ref, b_ref, mask_ref, o_ref, patch_ref, *, Wp):
    """ConvTranspose3d(C, C, k=(2,3,3), stride=(2,1,1), pad=(0,1,1)) for one
    input-depth slice; writes the two interleaved output depth slices.

    x_ref    : (1, C, Mp)   padded-flat input slice (zero ring / zero tail)
    w_ref    : (2C, 9C)     bf16, [kd*C+co, (kh*3+kw)*C+ci] = flipped torch w
    b_ref    : (C, 1)       bias
    mask_ref : (1, Mp)      1 at valid (interior) positions, 0 at ring/tail
    o_ref    : (2, C, Mp)   output depth slices 2d (row 0) and 2d+1 (row 1)
    patch_ref: (9C, Mp)     f32 im2col scratch
    """
    _, C, Mp = x_ref.shape
    x = x_ref[0]                                            # (C, Mp)
    t = 0
    for kh in range(3):
        for kw in range(3):
            off = (kh - 1) * Wp + (kw - 1)                  # flat tap offset
            tap = x if off == 0 else pltpu.roll(x, (-off) % Mp, axis=1)
            patch_ref[t * C:(t + 1) * C, :] = tap
            t += 1
    acc = jnp.dot(w_ref[...], patch_ref[...].astype(w_ref.dtype),
                  preferred_element_type=jnp.float32)       # (2C, Mp) f32
    mask = mask_ref[...]                                    # (1, Mp)
    bias = b_ref[...]                                       # (C, 1)
    o_ref[0] = (acc[0:C, :] + bias) * mask
    o_ref[1] = (acc[C:2 * C, :] + bias) * mask


def conv_stats_kernel(xm_ref, x0_ref, xp_ref, w_ref, mask_ref,
                      o_ref, st_ref, patch_ref, *, Wp):
    """Conv3d(Ci, Co, k=3, pad=1, bias=False) for one output-depth slice,
    plus masked per-slice BatchNorm partial stats (sum, sum of squares).

    xm/x0/xp : (1, Ci, Mp)  input depth slices d-1, d, d+1 (clamped at edges)
    w_ref    : (Co, 27*Ci)  bf16, [co, ((kd*3+kh)*3+kw)*Ci+ci] = torch w
    mask_ref : (1, Mp)
    o_ref    : (1, Co, Mp)  raw conv output (garbage at ring/tail; masked later)
    st_ref   : (1, Co, 2)   [:,0]=sum, [:,1]=sum of squares over valid positions
    patch_ref: (27*Ci, Mp)  f32 im2col scratch
    """
    d = pl.program_id(0)
    nd = pl.num_programs(0)
    _, Ci, Mp = x0_ref.shape
    planes = (xm_ref[0], x0_ref[0], xp_ref[0])              # (Ci, Mp) each
    t = 0
    for kd in range(3):
        xs = planes[kd]
        for kh in range(3):
            for kw in range(3):
                off = (kh - 1) * Wp + (kw - 1)
                tap = xs if off == 0 else pltpu.roll(xs, (-off) % Mp, axis=1)
                patch_ref[t * Ci:(t + 1) * Ci, :] = tap
                t += 1

    nine = 9 * Ci

    @pl.when(d == 0)                       # zero the kd=0 taps (depth halo)
    def _():
        patch_ref[0:nine, :] = jnp.zeros((nine, Mp), patch_ref.dtype)

    @pl.when(d == nd - 1)                  # zero the kd=2 taps (depth halo)
    def _():
        patch_ref[2 * nine:3 * nine, :] = jnp.zeros((nine, Mp), patch_ref.dtype)

    acc = jnp.dot(w_ref[...], patch_ref[...].astype(w_ref.dtype),
                  preferred_element_type=jnp.float32)       # (Co, Mp) f32
    o_ref[0] = acc
    am = acc * mask_ref[...]
    st_ref[0, :, 0:1] = jnp.sum(am, axis=1, keepdims=True)
    st_ref[0, :, 1:2] = jnp.sum(am * acc, axis=1, keepdims=True)


def bn_relu_kernel(x_ref, sc_ref, sh_ref, mask_ref, o_ref):
    """Elementwise BN(scale, shift) + ReLU; re-zeroes ring/tail positions.

    x_ref : (1, Co, Mp); sc_ref/sh_ref: (Co, 1); mask_ref: (1, Mp)
    o_ref : (1, Co, Mp)
    """
    o_ref[0] = jnp.maximum(x_ref[0] * sc_ref[...] + sh_ref[...], 0.0) \
        * mask_ref[...]


# ------------------------------ JAX wrappers ---------------------------------

def up_call(x_flat, w_up, b_up, mask, *, Wp):
    """x_flat: (D, C, Mp) padded-flat; w_up: torch (C, C, 2, 3, 3); b_up: (C,).
    Returns (2D, C, Mp), depth interleaved as 2d+kd."""
    D, C, Mp = x_flat.shape
    wf = (jnp.flip(w_up, axis=(3, 4))          # spatial flip for transposed conv
          .transpose(2, 1, 3, 4, 0)            # (kd, co, kh, kw, ci)
          .reshape(2 * C, 9 * C)
          .astype(MXU_DTYPE))
    bias = b_up.reshape(C, 1).astype(jnp.float32)
    return pl.pallas_call(
        functools.partial(up_kernel, Wp=Wp),
        out_shape=jax.ShapeDtypeStruct((2 * D, C, Mp), jnp.float32),
        grid=(D,),
        in_specs=[
            pl.BlockSpec((1, C, Mp), lambda d: (d, 0, 0)),
            pl.BlockSpec((2 * C, 9 * C), lambda d: (0, 0)),
            pl.BlockSpec((C, 1), lambda d: (0, 0)),
            pl.BlockSpec((1, Mp), lambda d: (0, 0)),
        ],
        out_specs=pl.BlockSpec((2, C, Mp), lambda d: (d, 0, 0)),
        scratch_shapes=[pltpu.VMEM((9 * C, Mp), jnp.float32)],
        compiler_params=_cparams(),
    )(x_flat, wf, bias, mask)


def conv_call(z, w, mask, *, Wp):
    """z: (D2, Ci, Mp) padded-flat (zero ring/tail); w: torch (Co, Ci, 3, 3, 3).
    Returns raw conv output (D2, Co, Mp) and per-slice stats (D2, Co, 2)."""
    D2, Ci, Mp = z.shape
    Co = w.shape[0]
    wmat = w.transpose(0, 2, 3, 4, 1).reshape(Co, 27 * Ci).astype(MXU_DTYPE)
    return pl.pallas_call(
        functools.partial(conv_stats_kernel, Wp=Wp),
        out_shape=(jax.ShapeDtypeStruct((D2, Co, Mp), jnp.float32),
                   jax.ShapeDtypeStruct((D2, Co, 2), jnp.float32)),
        grid=(D2,),
        in_specs=[
            pl.BlockSpec((1, Ci, Mp), lambda d: (jnp.maximum(d - 1, 0), 0, 0)),
            pl.BlockSpec((1, Ci, Mp), lambda d: (d, 0, 0)),
            pl.BlockSpec((1, Ci, Mp),
                         lambda d: (jnp.minimum(d + 1, D2 - 1), 0, 0)),
            pl.BlockSpec((Co, 27 * Ci), lambda d: (0, 0)),
            pl.BlockSpec((1, Mp), lambda d: (0, 0)),
        ],
        out_specs=(pl.BlockSpec((1, Co, Mp), lambda d: (d, 0, 0)),
                   pl.BlockSpec((1, Co, 2), lambda d: (d, 0, 0))),
        scratch_shapes=[pltpu.VMEM((27 * Ci, Mp), jnp.float32)],
        compiler_params=_cparams(),
    )(z, z, z, wmat, mask)


def bn_relu_call(conv, scale, shift, mask):
    D2, Co, Mp = conv.shape
    return pl.pallas_call(
        bn_relu_kernel,
        out_shape=jax.ShapeDtypeStruct((D2, Co, Mp), jnp.float32),
        grid=(D2,),
        in_specs=[
            pl.BlockSpec((1, Co, Mp), lambda d: (d, 0, 0)),
            pl.BlockSpec((Co, 1), lambda d: (0, 0)),
            pl.BlockSpec((Co, 1), lambda d: (0, 0)),
            pl.BlockSpec((1, Mp), lambda d: (0, 0)),
        ],
        out_specs=pl.BlockSpec((1, Co, Mp), lambda d: (d, 0, 0)),
        compiler_params=_cparams(),
    )(conv, scale, shift, mask)


def time_interpolate_forward(x_ncdhw, p, eps=EPS):
    """Full Time_Interpolate forward. x: (N, Cin, D, H, W) -> (N, Cout, 2D, H, W)."""
    N, Cin, D, H, W = x_ncdhw.shape
    Hp, Wp = H + 2, W + 2
    Mv = N * Hp * Wp                                   # valid flat extent
    Mp = ((Mv + LANE - 1) // LANE) * LANE              # lane-padded flat extent
    D2 = 2 * D
    cnt = D2 * N * H * W                               # BN element count / channel

    # mask of interior (non-ring, non-tail) positions in the padded-flat layout
    m2 = jnp.zeros((Hp, Wp), jnp.float32).at[1:H + 1, 1:W + 1].set(1.0)
    mask = jnp.pad(jnp.tile(m2.reshape(1, -1), (N, 1)).reshape(1, Mv),
                   ((0, 0), (0, Mp - Mv)))

    # NCDHW -> (D, C, N, Hp, Wp) -> padded-flat (D, C, Mp)
    x = jnp.transpose(x_ncdhw, (2, 1, 0, 3, 4))
    x = jnp.pad(x, ((0, 0), (0, 0), (0, 0), (1, 1), (1, 1)))
    x = jnp.pad(x.reshape(D, Cin, Mv), ((0, 0), (0, 0), (0, Mp - Mv)))

    y = up_call(x, p['up_w'], p['up_b'], mask, Wp=Wp)  # (2D, Cin, Mp)

    def cbr(z, w, g, b):
        Co = w.shape[0]
        conv, stats = conv_call(z, w, mask, Wp=Wp)
        tot = jnp.sum(stats, axis=0)                   # (Co, 2)
        mean = tot[:, 0] / cnt
        var = jnp.maximum(tot[:, 1] / cnt - mean * mean, 0.0)   # biased var
        scale = g * jax.lax.rsqrt(var + eps)
        shift = b - mean * scale
        return bn_relu_call(conv,
                            scale.reshape(Co, 1).astype(jnp.float32),
                            shift.reshape(Co, 1).astype(jnp.float32),
                            mask)

    h = cbr(y, p['w1'], p['g1'], p['b1'])
    h = cbr(h, p['w2'], p['g2'], p['b2'])
    Co = p['w2'].shape[0]

    out = h[:, :, :Mv].reshape(D2, Co, N, Hp, Wp)[:, :, :, 1:H + 1, 1:W + 1]
    return jnp.transpose(out, (2, 1, 0, 3, 4))         # -> (N, Co, 2D, H, W)


# --------------------------- pure-JAX reference ------------------------------

def reference_forward(x, p, eps=EPS):
    """PyTorch-semantics reference. Conv inputs/weights are cast to bf16 with
    f32 accumulation to mirror the kernel's MXU dtype policy."""
    dn = ('NCDHW', 'OIDHW', 'NCDHW')
    cast = lambda a: a.astype(jnp.bfloat16)
    # ConvTranspose3d == conv with lhs_dilation=stride, pad=k-1-p, flipped
    # kernel, in/out channels swapped.
    w_eq = jnp.flip(p['up_w'], axis=(2, 3, 4)).transpose(1, 0, 2, 3, 4)
    y = jax.lax.conv_general_dilated(
        cast(x), cast(w_eq), window_strides=(1, 1, 1),
        padding=((1, 1), (1, 1), (1, 1)), lhs_dilation=(2, 1, 1),
        dimension_numbers=dn, preferred_element_type=jnp.float32)
    y = y + p['up_b'].reshape(1, -1, 1, 1, 1)

    def cbr(z, w, g, b):
        z = jax.lax.conv_general_dilated(
            cast(z), cast(w), (1, 1, 1), ((1, 1), (1, 1), (1, 1)),
            dimension_numbers=dn, preferred_element_type=jnp.float32)
        m = z.mean(axis=(0, 2, 3, 4), keepdims=True)
        v = ((z - m) ** 2).mean(axis=(0, 2, 3, 4), keepdims=True)
        z = (z - m) * jax.lax.rsqrt(v + eps) * g.reshape(1, -1, 1, 1, 1) \
            + b.reshape(1, -1, 1, 1, 1)
        return jnp.maximum(z, 0.0)

    y = cbr(y, p['w1'], p['g1'], p['b1'])
    y = cbr(y, p['w2'], p['g2'], p['b2'])
    return y


# ----------------------------------- main -------------------------------------

if __name__ == "__main__":
    key = jax.random.PRNGKey(0)
    N, Cin, Cout, D, H, W = 2, 4, 8, 4, 8, 8   # DoubleConv: mid_channels = Cout
    ks = jax.random.split(key, 5)

    x = jax.random.normal(ks[0], (N, Cin, D, H, W), jnp.float32)
    params = dict(
        # ConvTranspose3d weight (Cin, Cout=Cin, 2, 3, 3) + bias (Cin,)
        up_w=jax.random.normal(ks[1], (Cin, Cin, 2, 3, 3), jnp.float32) * 0.2,
        up_b=jax.random.normal(ks[2], (Cin,), jnp.float32) * 0.1,
        # DoubleConv: Conv3d(Cin, Cout, 3) then Conv3d(Cout, Cout, 3), no bias
        w1=jax.random.normal(ks[3], (Cout, Cin, 3, 3, 3), jnp.float32) * 0.1,
        g1=jnp.ones((Cout,), jnp.float32),
        b1=jnp.zeros((Cout,), jnp.float32),
        w2=jax.random.normal(ks[4], (Cout, Cout, 3, 3, 3), jnp.float32) * 0.1,
        g2=jnp.ones((Cout,), jnp.float32),
        b2=jnp.zeros((Cout,), jnp.float32),
    )

    out = jax.block_until_ready(jax.jit(time_interpolate_forward)(x, params))
    assert out.shape == (N, Cout, 2 * D, H, W), out.shape

    ref = jax.block_until_ready(reference_forward(x, params))
    np.testing.assert_allclose(np.asarray(out), np.asarray(ref),
                               rtol=2e-2, atol=2e-2)
    print("KERNEL_OK")
</pallas_src>

<mosaic_0001>
module attributes {stable_mosaic.version = 11 : i64} {
  func.func @up_kernel(%arg0: i32, %arg1: memref<1x4x256xf32, #tpu.memory_space<vmem>>, %arg2: memref<8x36xbf16, #tpu.memory_space<vmem>>, %arg3: memref<4x1xf32, #tpu.memory_space<vmem>>, %arg4: memref<1x256xf32, #tpu.memory_space<vmem>>, %arg5: memref<2x4x256xf32, #tpu.memory_space<vmem>>, %arg6: memref<36x256xf32, #tpu.memory_space<vmem>>) attributes {dimension_semantics = [#tpu.dimension_semantics<parallel>], iteration_bounds = array<i64: 4>, scalar_prefetch = 0 : i64, scratch_operands = 1 : i64, tpu.core_type = #tpu.core_type<tc>, window_params = [{transform_indices = @transform_0, window_bounds = array<i64: 1, 4, 256>}, {pipeline_mode = #tpu.pipeline_mode<synchronous>, transform_indices = @transform_1, window_bounds = array<i64: 8, 36>}, {pipeline_mode = #tpu.pipeline_mode<synchronous>, transform_indices = @transform_2, window_bounds = array<i64: 4, 1>}, {pipeline_mode = #tpu.pipeline_mode<synchronous>, transform_indices = @transform_3, window_bounds = array<i64: 1, 256>}, {transform_indices = @transform_4, window_bounds = array<i64: 2, 4, 256>}]} {
    %c0 = arith.constant 0 : index
    %c0_0 = arith.constant 0 : index
    %c0_1 = arith.constant 0 : index
    %0 = vector.load %arg1[%c0, %c0_0, %c0_1] : memref<1x4x256xf32, #tpu.memory_space<vmem>>, vector<1x4x256xf32>
    %1 = vector.shape_cast %0 : vector<1x4x256xf32> to vector<4x256xf32>
    %c11_i32 = arith.constant 11 : i32
    %2 = tpu.dynamic_rotate %1 by %c11_i32 dim 1 : vector<4x256xf32>, i32 -> vector<4x256xf32>
    %c0_2 = arith.constant 0 : index
    %c0_3 = arith.constant 0 : index
    %3 = vector.load %arg6[%c0_2, %c0_3] : memref<36x256xf32, #tpu.memory_space<vmem>>, vector<4x256xf32>
    tpu.vector_store %arg6[%c0_2, %c0_3], %2 {strides = array<i32>} : memref<36x256xf32, #tpu.memory_space<vmem>>, vector<4x256xf32>,
    %c10_i32 = arith.constant 10 : i32
    %4 = tpu.dynamic_rotate %1 by %c10_i32 dim 1 : vector<4x256xf32>, i32 -> vector<4x256xf32>
    %c4 = arith.constant 4 : index
    %c0_4 = arith.constant 0 : index
    %5 = vector.load %arg6[%c4, %c0_4] : memref<36x256xf32, #tpu.memory_space<vmem>>, vector<4x256xf32>
    tpu.vector_store %arg6[%c4, %c0_4], %4 {strides = array<i32>} : memref<36x256xf32, #tpu.memory_space<vmem>>, vector<4x256xf32>,
    %c9_i32 = arith.constant 9 : i32
    %6 = tpu.dynamic_rotate %1 by %c9_i32 dim 1 : vector<4x256xf32>, i32 -> vector<4x256xf32>
    %c8 = arith.constant 8 : index
    %c0_5 = arith.constant 0 : index
    %7 = vector.load %arg6[%c8, %c0_5] : memref<36x256xf32, #tpu.memory_space<vmem>>, vector<4x256xf32>
    tpu.vector_store %arg6[%c8, %c0_5], %6 {strides = array<i32>} : memref<36x256xf32, #tpu.memory_space<vmem>>, vector<4x256xf32>,
    %c1_i32 = arith.constant 1 : i32
    %8 = tpu.dynamic_rotate %1 by %c1_i32 dim 1 : vector<4x256xf32>, i32 -> vector<4x256xf32>
    %c12 = arith.constant 12 : index
    %c0_6 = arith.constant 0 : index
    %9 = vector.load %arg6[%c12, %c0_6] : memref<36x256xf32, #tpu.memory_space<vmem>>, vector<4x256xf32>
    tpu.vector_store %arg6[%c12, %c0_6], %8 {strides = array<i32>} : memref<36x256xf32, #tpu.memory_space<vmem>>, vector<4x256xf32>,
    %c16 = arith.constant 16 : index
    %c0_7 = arith.constant 0 : index
    %10 = vector.load %arg6[%c16, %c0_7] : memref<36x256xf32, #tpu.memory_space<vmem>>, vector<4x256xf32>
    tpu.vector_store %arg6[%c16, %c0_7], %1 {strides = array<i32>} : memref<36x256xf32, #tpu.memory_space<vmem>>, vector<4x256xf32>,
    %c255_i32 = arith.constant 255 : i32
    %11 = tpu.dynamic_rotate %1 by %c255_i32 dim 1 : vector<4x256xf32>, i32 -> vector<4x256xf32>
    %c20 = arith.constant 20 : index
    %c0_8 = arith.constant 0 : index
    %12 = vector.load %arg6[%c20, %c0_8] : memref<36x256xf32, #tpu.memory_space<vmem>>, vector<4x256xf32>
    tpu.vector_store %arg6[%c20, %c0_8], %11 {strides = array<i32>} : memref<36x256xf32, #tpu.memory_space<vmem>>, vector<4x256xf32>,
    %c247_i32 = arith.constant 247 : i32
    %13 = tpu.dynamic_rotate %1 by %c247_i32 dim 1 : vector<4x256xf32>, i32 -> vector<4x256xf32>
    %c24 = arith.constant 24 : index
    %c0_9 = arith.constant 0 : index
    %14 = vector.load %arg6[%c24, %c0_9] : memref<36x256xf32, #tpu.memory_space<vmem>>, vector<4x256xf32>
    tpu.vector_store %arg6[%c24, %c0_9], %13 {strides = array<i32>} : memref<36x256xf32, #tpu.memory_space<vmem>>, vector<4x256xf32>,
    %c246_i32 = arith.constant 246 : i32
    %15 = tpu.dynamic_rotate %1 by %c246_i32 dim 1 : vector<4x256xf32>, i32 -> vector<4x256xf32>
    %c28 = arith.constant 28 : index
    %c0_10 = arith.constant 0 : index
    %16 = vector.load %arg6[%c28, %c0_10] : memref<36x256xf32, #tpu.memory_space<vmem>>, vector<4x256xf32>
    tpu.vector_store %arg6[%c28, %c0_10], %15 {strides = array<i32>} : memref<36x256xf32, #tpu.memory_space<vmem>>, vector<4x256xf32>,
    %c245_i32 = arith.constant 245 : i32
    %17 = tpu.dynamic_rotate %1 by %c245_i32 dim 1 : vector<4x256xf32>, i32 -> vector<4x256xf32>
    %c32 = arith.constant 32 : index
    %c0_11 = arith.constant 0 : index
    %18 = vector.load %arg6[%c32, %c0_11] : memref<36x256xf32, #tpu.memory_space<vmem>>, vector<4x256xf32>
    tpu.vector_store %arg6[%c32, %c0_11], %17 {strides = array<i32>} : memref<36x256xf32, #tpu.memory_space<vmem>>, vector<4x256xf32>,
    %c0_12 = arith.constant 0 : index
    %c0_13 = arith.constant 0 : index
    %19 = vector.load %arg2[%c0_12, %c0_13] : memref<8x36xbf16, #tpu.memory_space<vmem>>, vector<8x36xbf16>
    %c0_14 = arith.constant 0 : index
    %c0_15 = arith.constant 0 : index
    %20 = vector.load %arg6[%c0_14, %c0_15] : memref<36x256xf32, #tpu.memory_space<vmem>>, vector<36x256xf32>
    %21 = arith.truncf %20 : vector<36x256xf32> to vector<36x256xbf16>
    %cst = arith.constant dense<0.000000e+00> : vector<8x256xf32>
    %22 = tpu.matmul %19, %21, %cst {dimension_numbers = #tpu.dot_dimension_numbers<[1], [0], [0], [1], [0, 0, 1, 1], [], []>} : vector<8x36xbf16>, vector<36x256xbf16>, vector<8x256xf32> -> vector<8x256xf32>
    %c0_16 = arith.constant 0 : index
    %c0_17 = arith.constant 0 : index
    %23 = vector.load %arg4[%c0_16, %c0_17] : memref<1x256xf32, #tpu.memory_space<vmem>>, vector<1x256xf32>
    %c0_18 = arith.constant 0 : index
    %c0_19 = arith.constant 0 : index
    %24 = vector.load %arg3[%c0_18, %c0_19] : memref<4x1xf32, #tpu.memory_space<vmem>>, vector<4x1xf32>
    %25 = vector.extract_strided_slice %22 {offsets = [0, 0], sizes = [4, 256], strides = [1, 1]} : vector<8x256xf32> to vector<4x256xf32>
    %26 = vector.broadcast %24 : vector<4x1xf32> to vector<4x256xf32>
    %27 = arith.addf %25, %26 : vector<4x256xf32>
    %28 = vector.broadcast %23 : vector<1x256xf32> to vector<4x256xf32>
    %29 = arith.mulf %27, %28 : vector<4x256xf32>
    %c0_20 = arith.constant 0 : index
    %c0_21 = arith.constant 0 : index
    %c0_22 = arith.constant 0 : index
    %30 = vector.load %arg5[%c0_20, %c0_21, %c0_22] : memref<2x4x256xf32, #tpu.memory_space<vmem>>, vector<1x4x256xf32>
    %31 = vector.shape_cast %30 : vector<1x4x256xf32> to vector<4x256xf32>
    %32 = vector.shape_cast %29 : vector<4x256xf32> to vector<1x4x256xf32>
    tpu.vector_store %arg5[%c0_20, %c0_21, %c0_22], %32 {strides = array<i32>} : memref<2x4x256xf32, #tpu.memory_space<vmem>>, vector<1x4x256xf32>,
    %33 = vector.extract_strided_slice %22 {offsets = [4, 0], sizes = [4, 256], strides = [1, 1]} : vector<8x256xf32> to vector<4x256xf32>
    %34 = vector.broadcast %24 : vector<4x1xf32> to vector<4x256xf32>
    %35 = arith.addf %33, %34 : vector<4x256xf32>
    %36 = vector.broadcast %23 : vector<1x256xf32> to vector<4x256xf32>
    %37 = arith.mulf %35, %36 : vector<4x256xf32>
    %c1 = arith.constant 1 : index
    %c0_23 = arith.constant 0 : index
    %c0_24 = arith.constant 0 : index
    %38 = vector.load %arg5[%c1, %c0_23, %c0_24] : memref<2x4x256xf32, #tpu.memory_space<vmem>>, vector<1x4x256xf32>
    %39 = vector.shape_cast %38 : vector<1x4x256xf32> to vector<4x256xf32>
    %40 = vector.shape_cast %37 : vector<4x256xf32> to vector<1x4x256xf32>
    tpu.vector_store %arg5[%c1, %c0_23, %c0_24], %40 {strides = array<i32>} : memref<2x4x256xf32, #tpu.memory_space<vmem>>, vector<1x4x256xf32>,
    return
  }
  func.func @transform_0(%arg0: i32) -> (i32, i32, i32) {
    %c0_i32 = arith.constant 0 : i32
    %c0_i32_0 = arith.constant 0 : i32
    %c0_i32_1 = arith.constant 0 : i32
    return %arg0, %c0_i32, %c0_i32_0 : i32, i32, i32
  }
  func.func @transform_1(%arg0: i32) -> (i32, i32) {
    %c0_i32 = arith.constant 0 : i32
    %c0_i32_0 = arith.constant 0 : i32
    %c0_i32_1 = arith.constant 0 : i32
    return %c0_i32, %c0_i32_0 : i32, i32
  }
  func.func @transform_2(%arg0: i32) -> (i32, i32) {
    %c0_i32 = arith.constant 0 : i32
    %c0_i32_0 = arith.constant 0 : i32
    %c0_i32_1 = arith.constant 0 : i32
    return %c0_i32, %c0_i32_0 : i32, i32
  }
  func.func @transform_3(%arg0: i32) -> (i32, i32) {
    %c0_i32 = arith.constant 0 : i32
    %c0_i32_0 = arith.constant 0 : i32
    %c0_i32_1 = arith.constant 0 : i32
    return %c0_i32, %c0_i32_0 : i32, i32
  }
  func.func @transform_4(%arg0: i32) -> (i32, i32, i32) {
    %c0_i32 = arith.constant 0 : i32
    %c0_i32_0 = arith.constant 0 : i32
    %c0_i32_1 = arith.constant 0 : i32
    return %arg0, %c0_i32, %c0_i32_0 : i32, i32, i32
  }
}

module attributes {stable_mosaic.version = 11 : i64} {
  func.func @conv_stats_kernel(%arg0: i32, %arg1: memref<1x4x256xf32, #tpu.memory_space<vmem>>, %arg2: memref<1x4x256xf32, #tpu.memory_space<vmem>>, %arg3: memref<1x4x256xf32, #tpu.memory_space<vmem>>, %arg4: memref<8x108xbf16, #tpu.memory_space<vmem>>, %arg5: memref<1x256xf32, #tpu.memory_space<vmem>>, %arg6: memref<1x8x256xf32, #tpu.memory_space<vmem>>, %arg7: memref<1x8x2xf32, #tpu.memory_space<vmem>>, %arg8: memref<108x256xf32, #tpu.memory_space<vmem>>) attributes {dimension_semantics = [#tpu.dimension_semantics<parallel>], iteration_bounds = array<i64: 8>, scalar_prefetch = 0 : i64, scratch_operands = 1 : i64, tpu.core_type = #tpu.core_type<tc>, window_params = [{transform_indices = @transform_0, window_bounds = array<i64: 1, 4, 256>}, {transform_indices = @transform_1, window_bounds = array<i64: 1, 4, 256>}, {transform_indices = @transform_2, window_bounds = array<i64: 1, 4, 256>}, {pipeline_mode = #tpu.pipeline_mode<synchronous>, transform_indices = @transform_3, window_bounds = array<i64: 8, 108>}, {pipeline_mode = #tpu.pipeline_mode<synchronous>, transform_indices = @transform_4, window_bounds = array<i64: 1, 256>}, {transform_indices = @transform_5, window_bounds = array<i64: 1, 8, 256>}, {transform_indices = @transform_6, window_bounds = array<i64: 1, 8, 2>}]} {
    %c0 = arith.constant 0 : index
    %c0_0 = arith.constant 0 : index
    %c0_1 = arith.constant 0 : index
    %0 = vector.load %arg1[%c0, %c0_0, %c0_1] : memref<1x4x256xf32, #tpu.memory_space<vmem>>, vector<1x4x256xf32>
    %1 = vector.shape_cast %0 : vector<1x4x256xf32> to vector<4x256xf32>
    %c0_2 = arith.constant 0 : index
    %c0_3 = arith.constant 0 : index
    %c0_4 = arith.constant 0 : index
    %2 = vector.load %arg2[%c0_2, %c0_3, %c0_4] : memref<1x4x256xf32, #tpu.memory_space<vmem>>, vector<1x4x256xf32>
    %3 = vector.shape_cast %2 : vector<1x4x256xf32> to vector<4x256xf32>
    %c0_5 = arith.constant 0 : index
    %c0_6 = arith.constant 0 : index
    %c0_7 = arith.constant 0 : index
    %4 = vector.load %arg3[%c0_5, %c0_6, %c0_7] : memref<1x4x256xf32, #tpu.memory_space<vmem>>, vector<1x4x256xf32>
    %5 = vector.shape_cast %4 : vector<1x4x256xf32> to vector<4x256xf32>
    %c11_i32 = arith.constant 11 : i32
    %6 = tpu.dynamic_rotate %1 by %c11_i32 dim 1 : vector<4x256xf32>, i32 -> vector<4x256xf32>
    %c0_8 = arith.constant 0 : index
    %c0_9 = arith.constant 0 : index
    %7 = vector.load %arg8[%c0_8, %c0_9] : memref<108x256xf32, #tpu.memory_space<vmem>>, vector<4x256xf32>
    tpu.vector_store %arg8[%c0_8, %c0_9], %6 {strides = array<i32>} : memref<108x256xf32, #tpu.memory_space<vmem>>, vector<4x256xf32>,
    %c10_i32 = arith.constant 10 : i32
    %8 = tpu.dynamic_rotate %1 by %c10_i32 dim 1 : vector<4x256xf32>, i32 -> vector<4x256xf32>
    %c4 = arith.constant 4 : index
    %c0_10 = arith.constant 0 : index
    %9 = vector.load %arg8[%c4, %c0_10] : memref<108x256xf32, #tpu.memory_space<vmem>>, vector<4x256xf32>
    tpu.vector_store %arg8[%c4, %c0_10], %8 {strides = array<i32>} : memref<108x256xf32, #tpu.memory_space<vmem>>, vector<4x256xf32>,
    %c9_i32 = arith.constant 9 : i32
    %10 = tpu.dynamic_rotate %1 by %c9_i32 dim 1 : vector<4x256xf32>, i32 -> vector<4x256xf32>
    %c8 = arith.constant 8 : index
    %c0_11 = arith.constant 0 : index
    %11 = vector.load %arg8[%c8, %c0_11] : memref<108x256xf32, #tpu.memory_space<vmem>>, vector<4x256xf32>
    tpu.vector_store %arg8[%c8, %c0_11], %10 {strides = array<i32>} : memref<108x256xf32, #tpu.memory_space<vmem>>, vector<4x256xf32>,
    %c1_i32 = arith.constant 1 : i32
    %12 = tpu.dynamic_rotate %1 by %c1_i32 dim 1 : vector<4x256xf32>, i32 -> vector<4x256xf32>
    %c12 = arith.constant 12 : index
    %c0_12 = arith.constant 0 : index
    %13 = vector.load %arg8[%c12, %c0_12] : memref<108x256xf32, #tpu.memory_space<vmem>>, vector<4x256xf32>
    tpu.vector_store %arg8[%c12, %c0_12], %12 {strides = array<i32>} : memref<108x256xf32, #tpu.memory_space<vmem>>, vector<4x256xf32>,
    %c16 = arith.constant 16 : index
    %c0_13 = arith.constant 0 : index
    %14 = vector.load %arg8[%c16, %c0_13] : memref<108x256xf32, #tpu.memory_space<vmem>>, vector<4x256xf32>
    tpu.vector_store %arg8[%c16, %c0_13], %1 {strides = array<i32>} : memref<108x256xf32, #tpu.memory_space<vmem>>, vector<4x256xf32>,
    %c255_i32 = arith.constant 255 : i32
    %15 = tpu.dynamic_rotate %1 by %c255_i32 dim 1 : vector<4x256xf32>, i32 -> vector<4x256xf32>
    %c20 = arith.constant 20 : index
    %c0_14 = arith.constant 0 : index
    %16 = vector.load %arg8[%c20, %c0_14] : memref<108x256xf32, #tpu.memory_space<vmem>>, vector<4x256xf32>
    tpu.vector_store %arg8[%c20, %c0_14], %15 {strides = array<i32>} : memref<108x256xf32, #tpu.memory_space<vmem>>, vector<4x256xf32>,
    %c247_i32 = arith.constant 247 : i32
    %17 = tpu.dynamic_rotate %1 by %c247_i32 dim 1 : vector<4x256xf32>, i32 -> vector<4x256xf32>
    %c24 = arith.constant 24 : index
    %c0_15 = arith.constant 0 : index
    %18 = vector.load %arg8[%c24, %c0_15] : memref<108x256xf32, #tpu.memory_space<vmem>>, vector<4x256xf32>
    tpu.vector_store %arg8[%c24, %c0_15], %17 {strides = array<i32>} : memref<108x256xf32, #tpu.memory_space<vmem>>, vector<4x256xf32>,
    %c246_i32 = arith.constant 246 : i32
    %19 = tpu.dynamic_rotate %1 by %c246_i32 dim 1 : vector<4x256xf32>, i32 -> vector<4x256xf32>
    %c28 = arith.constant 28 : index
    %c0_16 = arith.constant 0 : index
    %20 = vector.load %arg8[%c28, %c0_16] : memref<108x256xf32, #tpu.memory_space<vmem>>, vector<4x256xf32>
    tpu.vector_store %arg8[%c28, %c0_16], %19 {strides = array<i32>} : memref<108x256xf32, #tpu.memory_space<vmem>>, vector<4x256xf32>,
    %c245_i32 = arith.constant 245 : i32
    %21 = tpu.dynamic_rotate %1 by %c245_i32 dim 1 : vector<4x256xf32>, i32 -> vector<4x256xf32>
    %c32 = arith.constant 32 : index
    %c0_17 = arith.constant 0 : index
    %22 = vector.load %arg8[%c32, %c0_17] : memref<108x256xf32, #tpu.memory_space<vmem>>, vector<4x256xf32>
    tpu.vector_store %arg8[%c32, %c0_17], %21 {strides = array<i32>} : memref<108x256xf32, #tpu.memory_space<vmem>>, vector<4x256xf32>,
    %c11_i32_18 = arith.constant 11 : i32
    %23 = tpu.dynamic_rotate %3 by %c11_i32_18 dim 1 : vector<4x256xf32>, i32 -> vector<4x256xf32>
    %c36 = arith.constant 36 : index
    %c0_19 = arith.constant 0 : index
    %24 = vector.load %arg8[%c36, %c0_19] : memref<108x256xf32, #tpu.memory_space<vmem>>, vector<4x256xf32>
    tpu.vector_store %arg8[%c36, %c0_19], %23 {strides = array<i32>} : memref<108x256xf32, #tpu.memory_space<vmem>>, vector<4x256xf32>,
    %c10_i32_20 = arith.constant 10 : i32
    %25 = tpu.dynamic_rotate %3 by %c10_i32_20 dim 1 : vector<4x256xf32>, i32 -> vector<4x256xf32>
    %c40 = arith.constant 40 : index
    %c0_21 = arith.constant 0 : index
    %26 = vector.load %arg8[%c40, %c0_21] : memref<108x256xf32, #tpu.memory_space<vmem>>, vector<4x256xf32>
    tpu.vector_store %arg8[%c40, %c0_21], %25 {strides = array<i32>} : memref<108x256xf32, #tpu.memory_space<vmem>>, vector<4x256xf32>,
    %c9_i32_22 = arith.constant 9 : i32
    %27 = tpu.dynamic_rotate %3 by %c9_i32_22 dim 1 : vector<4x256xf32>, i32 -> vector<4x256xf32>
    %c44 = arith.constant 44 : index
    %c0_23 = arith.constant 0 : index
    %28 = vector.load %arg8[%c44, %c0_23] : memref<108x256xf32, #tpu.memory_space<vmem>>, vector<4x256xf32>
    tpu.vector_store %arg8[%c44, %c0_23], %27 {strides = array<i32>} : memref<108x256xf32, #tpu.memory_space<vmem>>, vector<4x256xf32>,
    %c1_i32_24 = arith.constant 1 : i32
    %29 = tpu.dynamic_rotate %3 by %c1_i32_24 dim 1 : vector<4x256xf32>, i32 -> vector<4x256xf32>
    %c48 = arith.constant 48 : index
    %c0_25 = arith.constant 0 : index
    %30 = vector.load %arg8[%c48, %c0_25] : memref<108x256xf32, #tpu.memory_space<vmem>>, vector<4x256xf32>
    tpu.vector_store %arg8[%c48, %c0_25], %29 {strides = array<i32>} : memref<108x256xf32, #tpu.memory_space<vmem>>, vector<4x256xf32>,
    %c52 = arith.constant 52 : index
    %c0_26 = arith.constant 0 : index
    %31 = vector.load %arg8[%c52, %c0_26] : memref<108x256xf32, #tpu.memory_space<vmem>>, vector<4x256xf32>
    tpu.vector_store %arg8[%c52, %c0_26], %3 {strides = array<i32>} : memref<108x256xf32, #tpu.memory_space<vmem>>, vector<4x256xf32>,
    %c255_i32_27 = arith.constant 255 : i32
    %32 = tpu.dynamic_rotate %3 by %c255_i32_27 dim 1 : vector<4x256xf32>, i32 -> vector<4x256xf32>
    %c56 = arith.constant 56 : index
    %c0_28 = arith.constant 0 : index
    %33 = vector.load %arg8[%c56, %c0_28] : memref<108x256xf32, #tpu.memory_space<vmem>>, vector<4x256xf32>
    tpu.vector_store %arg8[%c56, %c0_28], %32 {strides = array<i32>} : memref<108x256xf32, #tpu.memory_space<vmem>>, vector<4x256xf32>,
    %c247_i32_29 = arith.constant 247 : i32
    %34 = tpu.dynamic_rotate %3 by %c247_i32_29 dim 1 : vector<4x256xf32>, i32 -> vector<4x256xf32>
    %c60 = arith.constant 60 : index
    %c0_30 = arith.constant 0 : index
    %35 = vector.load %arg8[%c60, %c0_30] : memref<108x256xf32, #tpu.memory_space<vmem>>, vector<4x256xf32>
    tpu.vector_store %arg8[%c60, %c0_30], %34 {strides = array<i32>} : memref<108x256xf32, #tpu.memory_space<vmem>>, vector<4x256xf32>,
    %c246_i32_31 = arith.constant 246 : i32
    %36 = tpu.dynamic_rotate %3 by %c246_i32_31 dim 1 : vector<4x256xf32>, i32 -> vector<4x256xf32>
    %c64 = arith.constant 64 : index
    %c0_32 = arith.constant 0 : index
    %37 = vector.load %arg8[%c64, %c0_32] : memref<108x256xf32, #tpu.memory_space<vmem>>, vector<4x256xf32>
    tpu.vector_store %arg8[%c64, %c0_32], %36 {strides = array<i32>} : memref<108x256xf32, #tpu.memory_space<vmem>>, vector<4x256xf32>,
    %c245_i32_33 = arith.constant 245 : i32
    %38 = tpu.dynamic_rotate %3 by %c245_i32_33 dim 1 : vector<4x256xf32>, i32 -> vector<4x256xf32>
    %c68 = arith.constant 68 : index
    %c0_34 = arith.constant 0 : index
    %39 = vector.load %arg8[%c68, %c0_34] : memref<108x256xf32, #tpu.memory_space<vmem>>, vector<4x256xf32>
    tpu.vector_store %arg8[%c68, %c0_34], %38 {strides = array<i32>} : memref<108x256xf32, #tpu.memory_space<vmem>>, vector<4x256xf32>,
    %c11_i32_35 = arith.constant 11 : i32
    %40 = tpu.dynamic_rotate %5 by %c11_i32_35 dim 1 : vector<4x256xf32>, i32 -> vector<4x256xf32>
    %c72 = arith.constant 72 : index
    %c0_36 = arith.constant 0 : index
    %41 = vector.load %arg8[%c72, %c0_36] : memref<108x256xf32, #tpu.memory_space<vmem>>, vector<4x256xf32>
    tpu.vector_store %arg8[%c72, %c0_36], %40 {strides = array<i32>} : memref<108x256xf32, #tpu.memory_space<vmem>>, vector<4x256xf32>,
    %c10_i32_37 = arith.constant 10 : i32
    %42 = tpu.dynamic_rotate %5 by %c10_i32_37 dim 1 : vector<4x256xf32>, i32 -> vector<4x256xf32>
    %c76 = arith.constant 76 : index
    %c0_38 = arith.constant 0 : index
    %43 = vector.load %arg8[%c76, %c0_38] : memref<108x256xf32, #tpu.memory_space<vmem>>, vector<4x256xf32>
    tpu.vector_store %arg8[%c76, %c0_38], %42 {strides = array<i32>} : memref<108x256xf32, #tpu.memory_space<vmem>>, vector<4x256xf32>,
    %c9_i32_39 = arith.constant 9 : i32
    %44 = tpu.dynamic_rotate %5 by %c9_i32_39 dim 1 : vector<4x256xf32>, i32 -> vector<4x256xf32>
    %c80 = arith.constant 80 : index
    %c0_40 = arith.constant 0 : index
    %45 = vector.load %arg8[%c80, %c0_40] : memref<108x256xf32, #tpu.memory_space<vmem>>, vector<4x256xf32>
    tpu.vector_store %arg8[%c80, %c0_40], %44 {strides = array<i32>} : memref<108x256xf32, #tpu.memory_space<vmem>>, vector<4x256xf32>,
    %c1_i32_41 = arith.constant 1 : i32
    %46 = tpu.dynamic_rotate %5 by %c1_i32_41 dim 1 : vector<4x256xf32>, i32 -> vector<4x256xf32>
    %c84 = arith.constant 84 : index
    %c0_42 = arith.constant 0 : index
    %47 = vector.load %arg8[%c84, %c0_42] : memref<108x256xf32, #tpu.memory_space<vmem>>, vector<4x256xf32>
    tpu.vector_store %arg8[%c84, %c0_42], %46 {strides = array<i32>} : memref<108x256xf32, #tpu.memory_space<vmem>>, vector<4x256xf32>,
    %c88 = arith.constant 88 : index
    %c0_43 = arith.constant 0 : index
    %48 = vector.load %arg8[%c88, %c0_43] : memref<108x256xf32, #tpu.memory_space<vmem>>, vector<4x256xf32>
    tpu.vector_store %arg8[%c88, %c0_43], %5 {strides = array<i32>} : memref<108x256xf32, #tpu.memory_space<vmem>>, vector<4x256xf32>,
    %c255_i32_44 = arith.constant 255 : i32
    %49 = tpu.dynamic_rotate %5 by %c255_i32_44 dim 1 : vector<4x256xf32>, i32 -> vector<4x256xf32>
    %c92 = arith.constant 92 : index
    %c0_45 = arith.constant 0 : index
    %50 = vector.load %arg8[%c92, %c0_45] : memref<108x256xf32, #tpu.memory_space<vmem>>, vector<4x256xf32>
    tpu.vector_store %arg8[%c92, %c0_45], %49 {strides = array<i32>} : memref<108x256xf32, #tpu.memory_space<vmem>>, vector<4x256xf32>,
    %c247_i32_46 = arith.constant 247 : i32
    %51 = tpu.dynamic_rotate %5 by %c247_i32_46 dim 1 : vector<4x256xf32>, i32 -> vector<4x256xf32>
    %c96 = arith.constant 96 : index
    %c0_47 = arith.constant 0 : index
    %52 = vector.load %arg8[%c96, %c0_47] : memref<108x256xf32, #tpu.memory_space<vmem>>, vector<4x256xf32>
    tpu.vector_store %arg8[%c96, %c0_47], %51 {strides = array<i32>} : memref<108x256xf32, #tpu.memory_space<vmem>>, vector<4x256xf32>,
    %c246_i32_48 = arith.constant 246 : i32
    %53 = tpu.dynamic_rotate %5 by %c246_i32_48 dim 1 : vector<4x256xf32>, i32 -> vector<4x256xf32>
    %c100 = arith.constant 100 : index
    %c0_49 = arith.constant 0 : index
    %54 = vector.load %arg8[%c100, %c0_49] : memref<108x256xf32, #tpu.memory_space<vmem>>, vector<4x256xf32>
    tpu.vector_store %arg8[%c100, %c0_49], %53 {strides = array<i32>} : memref<108x256xf32, #tpu.memory_space<vmem>>, vector<4x256xf32>,
    %c245_i32_50 = arith.constant 245 : i32
    %55 = tpu.dynamic_rotate %5 by %c245_i32_50 dim 1 : vector<4x256xf32>, i32 -> vector<4x256xf32>
    %c104 = arith.constant 104 : index
    %c0_51 = arith.constant 0 : index
    %56 = vector.load %arg8[%c104, %c0_51] : memref<108x256xf32, #tpu.memory_space<vmem>>, vector<4x256xf32>
    tpu.vector_store %arg8[%c104, %c0_51], %55 {strides = array<i32>} : memref<108x256xf32, #tpu.memory_space<vmem>>, vector<4x256xf32>,
    %c0_i32 = arith.constant 0 : i32
    %57 = arith.cmpi eq, %arg0, %c0_i32 : i32
    %58 = arith.extui %57 : i1 to i32
    %c0_i32_52 = arith.constant 0 : i32
    %59 = arith.cmpi ne, %58, %c0_i32_52 : i32
    scf.if %59 {
      %cst_70 = arith.constant 0.000000e+00 : f32
      %84 = vector.broadcast %cst_70 : f32 to vector<36x256xf32>
      %c0_71 = arith.constant 0 : index
      %c0_72 = arith.constant 0 : index
      %85 = vector.load %arg8[%c0_71, %c0_72] : memref<108x256xf32, #tpu.memory_space<vmem>>, vector<36x256xf32>
      tpu.vector_store %arg8[%c0_71, %c0_72], %84 {strides = array<i32>} : memref<108x256xf32, #tpu.memory_space<vmem>>, vector<36x256xf32>,
    } else {
    }
    %c7_i32 = arith.constant 7 : i32
    %60 = arith.cmpi eq, %arg0, %c7_i32 : i32
    %61 = arith.extui %60 : i1 to i32
    %c0_i32_53 = arith.constant 0 : i32
    %62 = arith.cmpi ne, %61, %c0_i32_53 : i32
    scf.if %62 {
      %cst_70 = arith.constant 0.000000e+00 : f32
      %84 = vector.broadcast %cst_70 : f32 to vector<36x256xf32>
      %c72_71 = arith.constant 72 : index
      %c0_72 = arith.constant 0 : index
      %85 = vector.load %arg8[%c72_71, %c0_72] : memref<108x256xf32, #tpu.memory_space<vmem>>, vector<36x256xf32>
      tpu.vector_store %arg8[%c72_71, %c0_72], %84 {strides = array<i32>} : memref<108x256xf32, #tpu.memory_space<vmem>>, vector<36x256xf32>,
    } else {
    }
    %c0_54 = arith.constant 0 : index
    %c0_55 = arith.constant 0 : index
    %63 = vector.load %arg4[%c0_54, %c0_55] : memref<8x108xbf16, #tpu.memory_space<vmem>>, vector<8x108xbf16>
    %c0_56 = arith.constant 0 : index
    %c0_57 = arith.constant 0 : index
    %64 = vector.load %arg8[%c0_56, %c0_57] : memref<108x256xf32, #tpu.memory_space<vmem>>, vector<108x256xf32>
    %65 = arith.truncf %64 : vector<108x256xf32> to vector<108x256xbf16>
    %cst = arith.constant dense<0.000000e+00> : vector<8x256xf32>
    %66 = tpu.matmul %63, %65, %cst {dimension_numbers = #tpu.dot_dimension_numbers<[1], [0], [0], [1], [0, 0, 1, 1], [], []>} : vector<8x108xbf16>, vector<108x256xbf16>, vector<8x256xf32> -> vector<8x256xf32>
    %c0_58 = arith.constant 0 : index
    %c0_59 = arith.constant 0 : index
    %c0_60 = arith.constant 0 : index
    %67 = vector.load %arg6[%c0_58, %c0_59, %c0_60] : memref<1x8x256xf32, #tpu.memory_space<vmem>>, vector<1x8x256xf32>
    %68 = vector.shape_cast %67 : vector<1x8x256xf32> to vector<8x256xf32>
    %69 = vector.shape_cast %66 : vector<8x256xf32> to vector<1x8x256xf32>
    tpu.vector_store %arg6[%c0_58, %c0_59, %c0_60], %69 {strides = array<i32>} : memref<1x8x256xf32, #tpu.memory_space<vmem>>, vector<1x8x256xf32>,
    %c0_61 = arith.constant 0 : index
    %c0_62 = arith.constant 0 : index
    %70 = vector.load %arg5[%c0_61, %c0_62] : memref<1x256xf32, #tpu.memory_space<vmem>>, vector<1x256xf32>
    %71 = vector.broadcast %70 : vector<1x256xf32> to vector<8x256xf32>
    %72 = arith.mulf %66, %71 : vector<8x256xf32>
    %cst_63 = arith.constant dense<0.000000e+00> : vector<8xf32>
    %73 = vector.multi_reduction <add>, %72, %cst_63 [1] : vector<8x256xf32> to vector<8xf32>
    %74 = vector.shape_cast %73 : vector<8xf32> to vector<8x1xf32>
    %c0_64 = arith.constant 0 : index
    %c0_65 = arith.constant 0 : index
    %c0_66 = arith.constant 0 : index
    %75 = vector.load %arg7[%c0_64, %c0_65, %c0_66] : memref<1x8x2xf32, #tpu.memory_space<vmem>>, vector<1x8x1xf32>
    %76 = vector.shape_cast %75 : vector<1x8x1xf32> to vector<8x1xf32>
    %77 = vector.shape_cast %74 : vector<8x1xf32> to vector<1x8x1xf32>
    tpu.vector_store %arg7[%c0_64, %c0_65, %c0_66], %77 {strides = array<i32>} : memref<1x8x2xf32, #tpu.memory_space<vmem>>, vector<1x8x1xf32>,
    %78 = arith.mulf %72, %66 : vector<8x256xf32>
    %cst_67 = arith.constant dense<0.000000e+00> : vector<8xf32>
    %79 = vector.multi_reduction <add>, %78, %cst_67 [1] : vector<8x256xf32> to vector<8xf32>
    %80 = vector.shape_cast %79 : vector<8xf32> to vector<8x1xf32>
    %c0_68 = arith.constant 0 : index
    %c0_69 = arith.constant 0 : index
    %c1 = arith.constant 1 : index
    %81 = vector.load %arg7[%c0_68, %c0_69, %c1] : memref<1x8x2xf32, #tpu.memory_space<vmem>>, vector<1x8x1xf32>
    %82 = vector.shape_cast %81 : vector<1x8x1xf32> to vector<8x1xf32>
    %83 = vector.shape_cast %80 : vector<8x1xf32> to vector<1x8x1xf32>
    tpu.vector_store %arg7[%c0_68, %c0_69, %c1], %83 {strides = array<i32>} : memref<1x8x2xf32, #tpu.memory_space<vmem>>, vector<1x8x1xf32>,
    return
  }
  func.func @transform_0(%arg0: i32) -> (i32, i32, i32) {
    %c1_i32 = arith.constant 1 : i32
    %0 = arith.subi %arg0, %c1_i32 : i32
    %c0_i32 = arith.constant 0 : i32
    %1 = arith.maxsi %0, %c0_i32 : i32
    %c0_i32_0 = arith.constant 0 : i32
    %c0_i32_1 = arith.constant 0 : i32
    %c0_i32_2 = arith.constant 0 : i32
    return %1, %c0_i32_0, %c0_i32_1 : i32, i32, i32
  }
  func.func @transform_1(%arg0: i32) -> (i32, i32, i32) {
    %c0_i32 = arith.constant 0 : i32
    %c0_i32_0 = arith.constant 0 : i32
    %c0_i32_1 = arith.constant 0 : i32
    return %arg0, %c0_i32, %c0_i32_0 : i32, i32, i32
  }
  func.func @transform_2(%arg0: i32) -> (i32, i32, i32) {
    %c1_i32 = arith.constant 1 : i32
    %0 = arith.addi %arg0, %c1_i32 : i32
    %c7_i32 = arith.constant 7 : i32
    %1 = arith.minsi %0, %c7_i32 : i32
    %c0_i32 = arith.constant 0 : i32
    %c0_i32_0 = arith.constant 0 : i32
    %c0_i32_1 = arith.constant 0 : i32
    return %1, %c0_i32, %c0_i32_0 : i32, i32, i32
  }
  func.func @transform_3(%arg0: i32) -> (i32, i32) {
    %c0_i32 = arith.constant 0 : i32
    %c0_i32_0 = arith.constant 0 : i32
    %c0_i32_1 = arith.constant 0 : i32
    return %c0_i32, %c0_i32_0 : i32, i32
  }
  func.func @transform_4(%arg0: i32) -> (i32, i32) {
    %c0_i32 = arith.constant 0 : i32
    %c0_i32_0 = arith.constant 0 : i32
    %c0_i32_1 = arith.constant 0 : i32
    return %c0_i32, %c0_i32_0 : i32, i32
  }
  func.func @transform_5(%arg0: i32) -> (i32, i32, i32) {
    %c0_i32 = arith.constant 0 : i32
    %c0_i32_0 = arith.constant 0 : i32
    %c0_i32_1 = arith.constant 0 : i32
    return %arg0, %c0_i32, %c0_i32_0 : i32, i32, i32
  }
  func.func @transform_6(%arg0: i32) -> (i32, i32, i32) {
    %c0_i32 = arith.constant 0 : i32
    %c0_i32_0 = arith.constant 0 : i32
    %c0_i32_1 = arith.constant 0 : i32
    return %arg0, %c0_i32, %c0_i32_0 : i32, i32, i32
  }
}

module attributes {stable_mosaic.version = 11 : i64} {
  func.func @bn_relu_kernel(%arg0: i32, %arg1: memref<1x8x256xf32, #tpu.memory_space<vmem>>, %arg2: memref<8x1xf32, #tpu.memory_space<vmem>>, %arg3: memref<8x1xf32, #tpu.memory_space<vmem>>, %arg4: memref<1x256xf32, #tpu.memory_space<vmem>>, %arg5: memref<1x8x256xf32, #tpu.memory_space<vmem>>) attributes {dimension_semantics = [#tpu.dimension_semantics<parallel>], iteration_bounds = array<i64: 8>, scalar_prefetch = 0 : i64, scratch_operands = 0 : i64, tpu.core_type = #tpu.core_type<tc>, window_params = [{transform_indices = @transform_0, window_bounds = array<i64: 1, 8, 256>}, {pipeline_mode = #tpu.pipeline_mode<synchronous>, transform_indices = @transform_1, window_bounds = array<i64: 8, 1>}, {pipeline_mode = #tpu.pipeline_mode<synchronous>, transform_indices = @transform_2, window_bounds = array<i64: 8, 1>}, {pipeline_mode = #tpu.pipeline_mode<synchronous>, transform_indices = @transform_3, window_bounds = array<i64: 1, 256>}, {transform_indices = @transform_4, window_bounds = array<i64: 1, 8, 256>}]} {
    %c0 = arith.constant 0 : index
    %c0_0 = arith.constant 0 : index
    %c0_1 = arith.constant 0 : index
    %0 = vector.load %arg1[%c0, %c0_0, %c0_1] : memref<1x8x256xf32, #tpu.memory_space<vmem>>, vector<1x8x256xf32>
    %1 = vector.shape_cast %0 : vector<1x8x256xf32> to vector<8x256xf32>
    %c0_2 = arith.constant 0 : index
    %c0_3 = arith.constant 0 : index
    %2 = vector.load %arg2[%c0_2, %c0_3] : memref<8x1xf32, #tpu.memory_space<vmem>>, vector<8x1xf32>
    %3 = vector.broadcast %2 : vector<8x1xf32> to vector<8x256xf32>
    %4 = arith.mulf %1, %3 : vector<8x256xf32>
    %c0_4 = arith.constant 0 : index
    %c0_5 = arith.constant 0 : index
    %5 = vector.load %arg3[%c0_4, %c0_5] : memref<8x1xf32, #tpu.memory_space<vmem>>, vector<8x1xf32>
    %6 = vector.broadcast %5 : vector<8x1xf32> to vector<8x256xf32>
    %7 = arith.addf %4, %6 : vector<8x256xf32>
    %cst = arith.constant 0.000000e+00 : f32
    %8 = vector.broadcast %cst : f32 to vector<8x256xf32>
    %9 = arith.maximumf %7, %8 : vector<8x256xf32>
    %c0_6 = arith.constant 0 : index
    %c0_7 = arith.constant 0 : index
    %10 = vector.load %arg4[%c0_6, %c0_7] : memref<1x256xf32, #tpu.memory_space<vmem>>, vector<1x256xf32>
    %11 = vector.broadcast %10 : vector<1x256xf32> to vector<8x256xf32>
    %12 = arith.mulf %9, %11 : vector<8x256xf32>
    %c0_8 = arith.constant 0 : index
    %c0_9 = arith.constant 0 : index
    %c0_10 = arith.constant 0 : index
    %13 = vector.load %arg5[%c0_8, %c0_9, %c0_10] : memref<1x8x256xf32, #tpu.memory_space<vmem>>, vector<1x8x256xf32>
    %14 = vector.shape_cast %13 : vector<1x8x256xf32> to vector<8x256xf32>
    %15 = vector.shape_cast %12 : vector<8x256xf32> to vector<1x8x256xf32>
    tpu.vector_store %arg5[%c0_8, %c0_9, %c0_10], %15 {strides = array<i32>} : memref<1x8x256xf32, #tpu.memory_space<vmem>>, vector<1x8x256xf32>,
    return
  }
  func.func @transform_0(%arg0: i32) -> (i32, i32, i32) {
    %c0_i32 = arith.constant 0 : i32
    %c0_i32_0 = arith.constant 0 : i32
    %c0_i32_1 = arith.constant 0 : i32
    return %arg0, %c0_i32, %c0_i32_0 : i32, i32, i32
  }
  func.func @transform_1(%arg0: i32) -> (i32, i32) {
    %c0_i32 = arith.constant 0 : i32
    %c0_i32_0 = arith.constant 0 : i32
    %c0_i32_1 = arith.constant 0 : i32
    return %c0_i32, %c0_i32_0 : i32, i32
  }
  func.func @transform_2(%arg0: i32) -> (i32, i32) {
    %c0_i32 = arith.constant 0 : i32
    %c0_i32_0 = arith.constant 0 : i32
    %c0_i32_1 = arith.constant 0 : i32
    return %c0_i32, %c0_i32_0 : i32, i32
  }
  func.func @transform_3(%arg0: i32) -> (i32, i32) {
    %c0_i32 = arith.constant 0 : i32
    %c0_i32_0 = arith.constant 0 : i32
    %c0_i32_1 = arith.constant 0 : i32
    return %c0_i32, %c0_i32_0 : i32, i32
  }
  func.func @transform_4(%arg0: i32) -> (i32, i32, i32) {
    %c0_i32 = arith.constant 0 : i32
    %c0_i32_0 = arith.constant 0 : i32
    %c0_i32_1 = arith.constant 0 : i32
    return %arg0, %c0_i32, %c0_i32_0 : i32, i32, i32
  }
}

module attributes {stable_mosaic.version = 11 : i64} {
  func.func @conv_stats_kernel(%arg0: i32, %arg1: memref<1x8x256xf32, #tpu.memory_space<vmem>>, %arg2: memref<1x8x256xf32, #tpu.memory_space<vmem>>, %arg3: memref<1x8x256xf32, #tpu.memory_space<vmem>>, %arg4: memref<8x216xbf16, #tpu.memory_space<vmem>>, %arg5: memref<1x256xf32, #tpu.memory_space<vmem>>, %arg6: memref<1x8x256xf32, #tpu.memory_space<vmem>>, %arg7: memref<1x8x2xf32, #tpu.memory_space<vmem>>, %arg8: memref<216x256xf32, #tpu.memory_space<vmem>>) attributes {dimension_semantics = [#tpu.dimension_semantics<parallel>], iteration_bounds = array<i64: 8>, scalar_prefetch = 0 : i64, scratch_operands = 1 : i64, tpu.core_type = #tpu.core_type<tc>, window_params = [{transform_indices = @transform_0, window_bounds = array<i64: 1, 8, 256>}, {transform_indices = @transform_1, window_bounds = array<i64: 1, 8, 256>}, {transform_indices = @transform_2, window_bounds = array<i64: 1, 8, 256>}, {pipeline_mode = #tpu.pipeline_mode<synchronous>, transform_indices = @transform_3, window_bounds = array<i64: 8, 216>}, {pipeline_mode = #tpu.pipeline_mode<synchronous>, transform_indices = @transform_4, window_bounds = array<i64: 1, 256>}, {transform_indices = @transform_5, window_bounds = array<i64: 1, 8, 256>}, {transform_indices = @transform_6, window_bounds = array<i64: 1, 8, 2>}]} {
    %c0 = arith.constant 0 : index
    %c0_0 = arith.constant 0 : index
    %c0_1 = arith.constant 0 : index
    %0 = vector.load %arg1[%c0, %c0_0, %c0_1] : memref<1x8x256xf32, #tpu.memory_space<vmem>>, vector<1x8x256xf32>
    %1 = vector.shape_cast %0 : vector<1x8x256xf32> to vector<8x256xf32>
    %c0_2 = arith.constant 0 : index
    %c0_3 = arith.constant 0 : index
    %c0_4 = arith.constant 0 : index
    %2 = vector.load %arg2[%c0_2, %c0_3, %c0_4] : memref<1x8x256xf32, #tpu.memory_space<vmem>>, vector<1x8x256xf32>
    %3 = vector.shape_cast %2 : vector<1x8x256xf32> to vector<8x256xf32>
    %c0_5 = arith.constant 0 : index
    %c0_6 = arith.constant 0 : index
    %c0_7 = arith.constant 0 : index
    %4 = vector.load %arg3[%c0_5, %c0_6, %c0_7] : memref<1x8x256xf32, #tpu.memory_space<vmem>>, vector<1x8x256xf32>
    %5 = vector.shape_cast %4 : vector<1x8x256xf32> to vector<8x256xf32>
    %c11_i32 = arith.constant 11 : i32
    %6 = tpu.dynamic_rotate %1 by %c11_i32 dim 1 : vector<8x256xf32>, i32 -> vector<8x256xf32>
    %c0_8 = arith.constant 0 : index
    %c0_9 = arith.constant 0 : index
    %7 = vector.load %arg8[%c0_8, %c0_9] : memref<216x256xf32, #tpu.memory_space<vmem>>, vector<8x256xf32>
    tpu.vector_store %arg8[%c0_8, %c0_9], %6 {strides = array<i32>} : memref<216x256xf32, #tpu.memory_space<vmem>>, vector<8x256xf32>,
    %c10_i32 = arith.constant 10 : i32
    %8 = tpu.dynamic_rotate %1 by %c10_i32 dim 1 : vector<8x256xf32>, i32 -> vector<8x256xf32>
    %c8 = arith.constant 8 : index
    %c0_10 = arith.constant 0 : index
    %9 = vector.load %arg8[%c8, %c0_10] : memref<216x256xf32, #tpu.memory_space<vmem>>, vector<8x256xf32>
    tpu.vector_store %arg8[%c8, %c0_10], %8 {strides = array<i32>} : memref<216x256xf32, #tpu.memory_space<vmem>>, vector<8x256xf32>,
    %c9_i32 = arith.constant 9 : i32
    %10 = tpu.dynamic_rotate %1 by %c9_i32 dim 1 : vector<8x256xf32>, i32 -> vector<8x256xf32>
    %c16 = arith.constant 16 : index
    %c0_11 = arith.constant 0 : index
    %11 = vector.load %arg8[%c16, %c0_11] : memref<216x256xf32, #tpu.memory_space<vmem>>, vector<8x256xf32>
    tpu.vector_store %arg8[%c16, %c0_11], %10 {strides = array<i32>} : memref<216x256xf32, #tpu.memory_space<vmem>>, vector<8x256xf32>,
    %c1_i32 = arith.constant 1 : i32
    %12 = tpu.dynamic_rotate %1 by %c1_i32 dim 1 : vector<8x256xf32>, i32 -> vector<8x256xf32>
    %c24 = arith.constant 24 : index
    %c0_12 = arith.constant 0 : index
    %13 = vector.load %arg8[%c24, %c0_12] : memref<216x256xf32, #tpu.memory_space<vmem>>, vector<8x256xf32>
    tpu.vector_store %arg8[%c24, %c0_12], %12 {strides = array<i32>} : memref<216x256xf32, #tpu.memory_space<vmem>>, vector<8x256xf32>,
    %c32 = arith.constant 32 : index
    %c0_13 = arith.constant 0 : index
    %14 = vector.load %arg8[%c32, %c0_13] : memref<216x256xf32, #tpu.memory_space<vmem>>, vector<8x256xf32>
    tpu.vector_store %arg8[%c32, %c0_13], %1 {strides = array<i32>} : memref<216x256xf32, #tpu.memory_space<vmem>>, vector<8x256xf32>,
    %c255_i32 = arith.constant 255 : i32
    %15 = tpu.dynamic_rotate %1 by %c255_i32 dim 1 : vector<8x256xf32>, i32 -> vector<8x256xf32>
    %c40 = arith.constant 40 : index
    %c0_14 = arith.constant 0 : index
    %16 = vector.load %arg8[%c40, %c0_14] : memref<216x256xf32, #tpu.memory_space<vmem>>, vector<8x256xf32>
    tpu.vector_store %arg8[%c40, %c0_14], %15 {strides = array<i32>} : memref<216x256xf32, #tpu.memory_space<vmem>>, vector<8x256xf32>,
    %c247_i32 = arith.constant 247 : i32
    %17 = tpu.dynamic_rotate %1 by %c247_i32 dim 1 : vector<8x256xf32>, i32 -> vector<8x256xf32>
    %c48 = arith.constant 48 : index
    %c0_15 = arith.constant 0 : index
    %18 = vector.load %arg8[%c48, %c0_15] : memref<216x256xf32, #tpu.memory_space<vmem>>, vector<8x256xf32>
    tpu.vector_store %arg8[%c48, %c0_15], %17 {strides = array<i32>} : memref<216x256xf32, #tpu.memory_space<vmem>>, vector<8x256xf32>,
    %c246_i32 = arith.constant 246 : i32
    %19 = tpu.dynamic_rotate %1 by %c246_i32 dim 1 : vector<8x256xf32>, i32 -> vector<8x256xf32>
    %c56 = arith.constant 56 : index
    %c0_16 = arith.constant 0 : index
    %20 = vector.load %arg8[%c56, %c0_16] : memref<216x256xf32, #tpu.memory_space<vmem>>, vector<8x256xf32>
    tpu.vector_store %arg8[%c56, %c0_16], %19 {strides = array<i32>} : memref<216x256xf32, #tpu.memory_space<vmem>>, vector<8x256xf32>,
    %c245_i32 = arith.constant 245 : i32
    %21 = tpu.dynamic_rotate %1 by %c245_i32 dim 1 : vector<8x256xf32>, i32 -> vector<8x256xf32>
    %c64 = arith.constant 64 : index
    %c0_17 = arith.constant 0 : index
    %22 = vector.load %arg8[%c64, %c0_17] : memref<216x256xf32, #tpu.memory_space<vmem>>, vector<8x256xf32>
    tpu.vector_store %arg8[%c64, %c0_17], %21 {strides = array<i32>} : memref<216x256xf32, #tpu.memory_space<vmem>>, vector<8x256xf32>,
    %c11_i32_18 = arith.constant 11 : i32
    %23 = tpu.dynamic_rotate %3 by %c11_i32_18 dim 1 : vector<8x256xf32>, i32 -> vector<8x256xf32>
    %c72 = arith.constant 72 : index
    %c0_19 = arith.constant 0 : index
    %24 = vector.load %arg8[%c72, %c0_19] : memref<216x256xf32, #tpu.memory_space<vmem>>, vector<8x256xf32>
    tpu.vector_store %arg8[%c72, %c0_19], %23 {strides = array<i32>} : memref<216x256xf32, #tpu.memory_space<vmem>>, vector<8x256xf32>,
    %c10_i32_20 = arith.constant 10 : i32
    %25 = tpu.dynamic_rotate %3 by %c10_i32_20 dim 1 : vector<8x256xf32>, i32 -> vector<8x256xf32>
    %c80 = arith.constant 80 : index
    %c0_21 = arith.constant 0 : index
    %26 = vector.load %arg8[%c80, %c0_21] : memref<216x256xf32, #tpu.memory_space<vmem>>, vector<8x256xf32>
    tpu.vector_store %arg8[%c80, %c0_21], %25 {strides = array<i32>} : memref<216x256xf32, #tpu.memory_space<vmem>>, vector<8x256xf32>,
    %c9_i32_22 = arith.constant 9 : i32
    %27 = tpu.dynamic_rotate %3 by %c9_i32_22 dim 1 : vector<8x256xf32>, i32 -> vector<8x256xf32>
    %c88 = arith.constant 88 : index
    %c0_23 = arith.constant 0 : index
    %28 = vector.load %arg8[%c88, %c0_23] : memref<216x256xf32, #tpu.memory_space<vmem>>, vector<8x256xf32>
    tpu.vector_store %arg8[%c88, %c0_23], %27 {strides = array<i32>} : memref<216x256xf32, #tpu.memory_space<vmem>>, vector<8x256xf32>,
    %c1_i32_24 = arith.constant 1 : i32
    %29 = tpu.dynamic_rotate %3 by %c1_i32_24 dim 1 : vector<8x256xf32>, i32 -> vector<8x256xf32>
    %c96 = arith.constant 96 : index
    %c0_25 = arith.constant 0 : index
    %30 = vector.load %arg8[%c96, %c0_25] : memref<216x256xf32, #tpu.memory_space<vmem>>, vector<8x256xf32>
    tpu.vector_store %arg8[%c96, %c0_25], %29 {strides = array<i32>} : memref<216x256xf32, #tpu.memory_space<vmem>>, vector<8x256xf32>,
    %c104 = arith.constant 104 : index
    %c0_26 = arith.constant 0 : index
    %31 = vector.load %arg8[%c104, %c0_26] : memref<216x256xf32, #tpu.memory_space<vmem>>, vector<8x256xf32>
    tpu.vector_store %arg8[%c104, %c0_26], %3 {strides = array<i32>} : memref<216x256xf32, #tpu.memory_space<vmem>>, vector<8x256xf32>,
    %c255_i32_27 = arith.constant 255 : i32
    %32 = tpu.dynamic_rotate %3 by %c255_i32_27 dim 1 : vector<8x256xf32>, i32 -> vector<8x256xf32>
    %c112 = arith.constant 112 : index
    %c0_28 = arith.constant 0 : index
    %33 = vector.load %arg8[%c112, %c0_28] : memref<216x256xf32, #tpu.memory_space<vmem>>, vector<8x256xf32>
    tpu.vector_store %arg8[%c112, %c0_28], %32 {strides = array<i32>} : memref<216x256xf32, #tpu.memory_space<vmem>>, vector<8x256xf32>,
    %c247_i32_29 = arith.constant 247 : i32
    %34 = tpu.dynamic_rotate %3 by %c247_i32_29 dim 1 : vector<8x256xf32>, i32 -> vector<8x256xf32>
    %c120 = arith.constant 120 : index
    %c0_30 = arith.constant 0 : index
    %35 = vector.load %arg8[%c120, %c0_30] : memref<216x256xf32, #tpu.memory_space<vmem>>, vector<8x256xf32>
    tpu.vector_store %arg8[%c120, %c0_30], %34 {strides = array<i32>} : memref<216x256xf32, #tpu.memory_space<vmem>>, vector<8x256xf32>,
    %c246_i32_31 = arith.constant 246 : i32
    %36 = tpu.dynamic_rotate %3 by %c246_i32_31 dim 1 : vector<8x256xf32>, i32 -> vector<8x256xf32>
    %c128 = arith.constant 128 : index
    %c0_32 = arith.constant 0 : index
    %37 = vector.load %arg8[%c128, %c0_32] : memref<216x256xf32, #tpu.memory_space<vmem>>, vector<8x256xf32>
    tpu.vector_store %arg8[%c128, %c0_32], %36 {strides = array<i32>} : memref<216x256xf32, #tpu.memory_space<vmem>>, vector<8x256xf32>,
    %c245_i32_33 = arith.constant 245 : i32
    %38 = tpu.dynamic_rotate %3 by %c245_i32_33 dim 1 : vector<8x256xf32>, i32 -> vector<8x256xf32>
    %c136 = arith.constant 136 : index
    %c0_34 = arith.constant 0 : index
    %39 = vector.load %arg8[%c136, %c0_34] : memref<216x256xf32, #tpu.memory_space<vmem>>, vector<8x256xf32>
    tpu.vector_store %arg8[%c136, %c0_34], %38 {strides = array<i32>} : memref<216x256xf32, #tpu.memory_space<vmem>>, vector<8x256xf32>,
    %c11_i32_35 = arith.constant 11 : i32
    %40 = tpu.dynamic_rotate %5 by %c11_i32_35 dim 1 : vector<8x256xf32>, i32 -> vector<8x256xf32>
    %c144 = arith.constant 144 : index
    %c0_36 = arith.constant 0 : index
    %41 = vector.load %arg8[%c144, %c0_36] : memref<216x256xf32, #tpu.memory_space<vmem>>, vector<8x256xf32>
    tpu.vector_store %arg8[%c144, %c0_36], %40 {strides = array<i32>} : memref<216x256xf32, #tpu.memory_space<vmem>>, vector<8x256xf32>,
    %c10_i32_37 = arith.constant 10 : i32
    %42 = tpu.dynamic_rotate %5 by %c10_i32_37 dim 1 : vector<8x256xf32>, i32 -> vector<8x256xf32>
    %c152 = arith.constant 152 : index
    %c0_38 = arith.constant 0 : index
    %43 = vector.load %arg8[%c152, %c0_38] : memref<216x256xf32, #tpu.memory_space<vmem>>, vector<8x256xf32>
    tpu.vector_store %arg8[%c152, %c0_38], %42 {strides = array<i32>} : memref<216x256xf32, #tpu.memory_space<vmem>>, vector<8x256xf32>,
    %c9_i32_39 = arith.constant 9 : i32
    %44 = tpu.dynamic_rotate %5 by %c9_i32_39 dim 1 : vector<8x256xf32>, i32 -> vector<8x256xf32>
    %c160 = arith.constant 160 : index
    %c0_40 = arith.constant 0 : index
    %45 = vector.load %arg8[%c160, %c0_40] : memref<216x256xf32, #tpu.memory_space<vmem>>, vector<8x256xf32>
    tpu.vector_store %arg8[%c160, %c0_40], %44 {strides = array<i32>} : memref<216x256xf32, #tpu.memory_space<vmem>>, vector<8x256xf32>,
    %c1_i32_41 = arith.constant 1 : i32
    %46 = tpu.dynamic_rotate %5 by %c1_i32_41 dim 1 : vector<8x256xf32>, i32 -> vector<8x256xf32>
    %c168 = arith.constant 168 : index
    %c0_42 = arith.constant 0 : index
    %47 = vector.load %arg8[%c168, %c0_42] : memref<216x256xf32, #tpu.memory_space<vmem>>, vector<8x256xf32>
    tpu.vector_store %arg8[%c168, %c0_42], %46 {strides = array<i32>} : memref<216x256xf32, #tpu.memory_space<vmem>>, vector<8x256xf32>,
    %c176 = arith.constant 176 : index
    %c0_43 = arith.constant 0 : index
    %48 = vector.load %arg8[%c176, %c0_43] : memref<216x256xf32, #tpu.memory_space<vmem>>, vector<8x256xf32>
    tpu.vector_store %arg8[%c176, %c0_43], %5 {strides = array<i32>} : memref<216x256xf32, #tpu.memory_space<vmem>>, vector<8x256xf32>,
    %c255_i32_44 = arith.constant 255 : i32
    %49 = tpu.dynamic_rotate %5 by %c255_i32_44 dim 1 : vector<8x256xf32>, i32 -> vector<8x256xf32>
    %c184 = arith.constant 184 : index
    %c0_45 = arith.constant 0 : index
    %50 = vector.load %arg8[%c184, %c0_45] : memref<216x256xf32, #tpu.memory_space<vmem>>, vector<8x256xf32>
    tpu.vector_store %arg8[%c184, %c0_45], %49 {strides = array<i32>} : memref<216x256xf32, #tpu.memory_space<vmem>>, vector<8x256xf32>,
    %c247_i32_46 = arith.constant 247 : i32
    %51 = tpu.dynamic_rotate %5 by %c247_i32_46 dim 1 : vector<8x256xf32>, i32 -> vector<8x256xf32>
    %c192 = arith.constant 192 : index
    %c0_47 = arith.constant 0 : index
    %52 = vector.load %arg8[%c192, %c0_47] : memref<216x256xf32, #tpu.memory_space<vmem>>, vector<8x256xf32>
    tpu.vector_store %arg8[%c192, %c0_47], %51 {strides = array<i32>} : memref<216x256xf32, #tpu.memory_space<vmem>>, vector<8x256xf32>,
    %c246_i32_48 = arith.constant 246 : i32
    %53 = tpu.dynamic_rotate %5 by %c246_i32_48 dim 1 : vector<8x256xf32>, i32 -> vector<8x256xf32>
    %c200 = arith.constant 200 : index
    %c0_49 = arith.constant 0 : index
    %54 = vector.load %arg8[%c200, %c0_49] : memref<216x256xf32, #tpu.memory_space<vmem>>, vector<8x256xf32>
    tpu.vector_store %arg8[%c200, %c0_49], %53 {strides = array<i32>} : memref<216x256xf32, #tpu.memory_space<vmem>>, vector<8x256xf32>,
    %c245_i32_50 = arith.constant 245 : i32
    %55 = tpu.dynamic_rotate %5 by %c245_i32_50 dim 1 : vector<8x256xf32>, i32 -> vector<8x256xf32>
    %c208 = arith.constant 208 : index
    %c0_51 = arith.constant 0 : index
    %56 = vector.load %arg8[%c208, %c0_51] : memref<216x256xf32, #tpu.memory_space<vmem>>, vector<8x256xf32>
    tpu.vector_store %arg8[%c208, %c0_51], %55 {strides = array<i32>} : memref<216x256xf32, #tpu.memory_space<vmem>>, vector<8x256xf32>,
    %c0_i32 = arith.constant 0 : i32
    %57 = arith.cmpi eq, %arg0, %c0_i32 : i32
    %58 = arith.extui %57 : i1 to i32
    %c0_i32_52 = arith.constant 0 : i32
    %59 = arith.cmpi ne, %58, %c0_i32_52 : i32
    scf.if %59 {
      %cst_70 = arith.constant 0.000000e+00 : f32
      %84 = vector.broadcast %cst_70 : f32 to vector<72x256xf32>
      %c0_71 = arith.constant 0 : index
      %c0_72 = arith.constant 0 : index
      %85 = vector.load %arg8[%c0_71, %c0_72] : memref<216x256xf32, #tpu.memory_space<vmem>>, vector<72x256xf32>
      tpu.vector_store %arg8[%c0_71, %c0_72], %84 {strides = array<i32>} : memref<216x256xf32, #tpu.memory_space<vmem>>, vector<72x256xf32>,
    } else {
    }
    %c7_i32 = arith.constant 7 : i32
    %60 = arith.cmpi eq, %arg0, %c7_i32 : i32
    %61 = arith.extui %60 : i1 to i32
    %c0_i32_53 = arith.constant 0 : i32
    %62 = arith.cmpi ne, %61, %c0_i32_53 : i32
    scf.if %62 {
      %cst_70 = arith.constant 0.000000e+00 : f32
      %84 = vector.broadcast %cst_70 : f32 to vector<72x256xf32>
      %c144_71 = arith.constant 144 : index
      %c0_72 = arith.constant 0 : index
      %85 = vector.load %arg8[%c144_71, %c0_72] : memref<216x256xf32, #tpu.memory_space<vmem>>, vector<72x256xf32>
      tpu.vector_store %arg8[%c144_71, %c0_72], %84 {strides = array<i32>} : memref<216x256xf32, #tpu.memory_space<vmem>>, vector<72x256xf32>,
    } else {
    }
    %c0_54 = arith.constant 0 : index
    %c0_55 = arith.constant 0 : index
    %63 = vector.load %arg4[%c0_54, %c0_55] : memref<8x216xbf16, #tpu.memory_space<vmem>>, vector<8x216xbf16>
    %c0_56 = arith.constant 0 : index
    %c0_57 = arith.constant 0 : index
    %64 = vector.load %arg8[%c0_56, %c0_57] : memref<216x256xf32, #tpu.memory_space<vmem>>, vector<216x256xf32>
    %65 = arith.truncf %64 : vector<216x256xf32> to vector<216x256xbf16>
    %cst = arith.constant dense<0.000000e+00> : vector<8x256xf32>
    %66 = tpu.matmul %63, %65, %cst {dimension_numbers = #tpu.dot_dimension_numbers<[1], [0], [0], [1], [0, 0, 1, 1], [], []>} : vector<8x216xbf16>, vector<216x256xbf16>, vector<8x256xf32> -> vector<8x256xf32>
    %c0_58 = arith.constant 0 : index
    %c0_59 = arith.constant 0 : index
    %c0_60 = arith.constant 0 : index
    %67 = vector.load %arg6[%c0_58, %c0_59, %c0_60] : memref<1x8x256xf32, #tpu.memory_space<vmem>>, vector<1x8x256xf32>
    %68 = vector.shape_cast %67 : vector<1x8x256xf32> to vector<8x256xf32>
    %69 = vector.shape_cast %66 : vector<8x256xf32> to vector<1x8x256xf32>
    tpu.vector_store %arg6[%c0_58, %c0_59, %c0_60], %69 {strides = array<i32>} : memref<1x8x256xf32, #tpu.memory_space<vmem>>, vector<1x8x256xf32>,
    %c0_61 = arith.constant 0 : index
    %c0_62 = arith.constant 0 : index
    %70 = vector.load %arg5[%c0_61, %c0_62] : memref<1x256xf32, #tpu.memory_space<vmem>>, vector<1x256xf32>
    %71 = vector.broadcast %70 : vector<1x256xf32> to vector<8x256xf32>
    %72 = arith.mulf %66, %71 : vector<8x256xf32>
    %cst_63 = arith.constant dense<0.000000e+00> : vector<8xf32>
    %73 = vector.multi_reduction <add>, %72, %cst_63 [1] : vector<8x256xf32> to vector<8xf32>
    %74 = vector.shape_cast %73 : vector<8xf32> to vector<8x1xf32>
    %c0_64 = arith.constant 0 : index
    %c0_65 = arith.constant 0 : index
    %c0_66 = arith.constant 0 : index
    %75 = vector.load %arg7[%c0_64, %c0_65, %c0_66] : memref<1x8x2xf32, #tpu.memory_space<vmem>>, vector<1x8x1xf32>
    %76 = vector.shape_cast %75 : vector<1x8x1xf32> to vector<8x1xf32>
    %77 = vector.shape_cast %74 : vector<8x1xf32> to vector<1x8x1xf32>
    tpu.vector_store %arg7[%c0_64, %c0_65, %c0_66], %77 {strides = array<i32>} : memref<1x8x2xf32, #tpu.memory_space<vmem>>, vector<1x8x1xf32>,
    %78 = arith.mulf %72, %66 : vector<8x256xf32>
    %cst_67 = arith.constant dense<0.000000e+00> : vector<8xf32>
    %79 = vector.multi_reduction <add>, %78, %cst_67 [1] : vector<8x256xf32> to vector<8xf32>
    %80 = vector.shape_cast %79 : vector<8xf32> to vector<8x1xf32>
    %c0_68 = arith.constant 0 : index
    %c0_69 = arith.constant 0 : index
    %c1 = arith.constant 1 : index
    %81 = vector.load %arg7[%c0_68, %c0_69, %c1] : memref<1x8x2xf32, #tpu.memory_space<vmem>>, vector<1x8x1xf32>
    %82 = vector.shape_cast %81 : vector<1x8x1xf32> to vector<8x1xf32>
    %83 = vector.shape_cast %80 : vector<8x1xf32> to vector<1x8x1xf32>
    tpu.vector_store %arg7[%c0_68, %c0_69, %c1], %83 {strides = array<i32>} : memref<1x8x2xf32, #tpu.memory_space<vmem>>, vector<1x8x1xf32>,
    return
  }
  func.func @transform_0(%arg0: i32) -> (i32, i32, i32) {
    %c1_i32 = arith.constant 1 : i32
    %0 = arith.subi %arg0, %c1_i32 : i32
    %c0_i32 = arith.constant 0 : i32
    %1 = arith.maxsi %0, %c0_i32 : i32
    %c0_i32_0 = arith.constant 0 : i32
    %c0_i32_1 = arith.constant 0 : i32
    %c0_i32_2 = arith.constant 0 : i32
    return %1, %c0_i32_0, %c0_i32_1 : i32, i32, i32
  }
  func.func @transform_1(%arg0: i32) -> (i32, i32, i32) {
    %c0_i32 = arith.constant 0 : i32
    %c0_i32_0 = arith.constant 0 : i32
    %c0_i32_1 = arith.constant 0 : i32
    return %arg0, %c0_i32, %c0_i32_0 : i32, i32, i32
  }
  func.func @transform_2(%arg0: i32) -> (i32, i32, i32) {
    %c1_i32 = arith.constant 1 : i32
    %0 = arith.addi %arg0, %c1_i32 : i32
    %c7_i32 = arith.constant 7 : i32
    %1 = arith.minsi %0, %c7_i32 : i32
    %c0_i32 = arith.constant 0 : i32
    %c0_i32_0 = arith.constant 0 : i32
    %c0_i32_1 = arith.constant 0 : i32
    return %1, %c0_i32, %c0_i32_0 : i32, i32, i32
  }
  func.func @transform_3(%arg0: i32) -> (i32, i32) {
    %c0_i32 = arith.constant 0 : i32
    %c0_i32_0 = arith.constant 0 : i32
    %c0_i32_1 = arith.constant 0 : i32
    return %c0_i32, %c0_i32_0 : i32, i32
  }
  func.func @transform_4(%arg0: i32) -> (i32, i32) {
    %c0_i32 = arith.constant 0 : i32
    %c0_i32_0 = arith.constant 0 : i32
    %c0_i32_1 = arith.constant 0 : i32
    return %c0_i32, %c0_i32_0 : i32, i32
  }
  func.func @transform_5(%arg0: i32) -> (i32, i32, i32) {
    %c0_i32 = arith.constant 0 : i32
    %c0_i32_0 = arith.constant 0 : i32
    %c0_i32_1 = arith.constant 0 : i32
    return %arg0, %c0_i32, %c0_i32_0 : i32, i32, i32
  }
  func.func @transform_6(%arg0: i32) -> (i32, i32, i32) {
    %c0_i32 = arith.constant 0 : i32
    %c0_i32_0 = arith.constant 0 : i32
    %c0_i32_1 = arith.constant 0 : i32
    return %arg0, %c0_i32, %c0_i32_0 : i32, i32, i32
  }
}

</mosaic_0001>

<bundles_post_ra>
// kernel: tile.7
= control target key start
LH: loop header
LB: loop body
LE: loop exit
PB: predicated region body
PF: predicated region fallthrough
CT: control target
= control target key end

     0   :  { %vm14_vm0 = vcmask 228352   ;;  %vm8_vm1 = vcmask 818176   ;;  %vm18_vm2 = vcmask 588800   ;;  %vm21_vm3 = vcmask 1048352   ;;  %s59_s0 = inlined_call_operand.vmem [shape: f32[2,1,1,100], index: 0, kind: input, shape index: {}]   ;;  %s60_s1 = inlined_call_operand.vmem [shape: f32[1,200], index: 1, kind: output, shape index: {}]  }
   0x1   :  { %v5_v0 = vld [vmem:[%s59_s0] sm:$0x3]  ;;  %s39_s0 = smov 100  }
   0x2   :  { %6 = vst [vmem:[#allocation1] sm:$0x3] %v5_v0 }
   0x9   :  { %v11_v1 = vld [vmem:[#allocation1 + $0x1] sm:$0x1]   ;;  %v7_v3 = vld [vmem:[#allocation1] sm:$0x1]  }
   0xa   :  { %v13_v2 = vld [vmem:[#allocation1 + $0x1] sm:$0x1]   ;;  %9 = vst.msk [vmem:[#allocation0] sm:$0x1] %vm8_vm1, %v7_v3  }
   0xb   :  { %v15_v4 = vsel %vm14_vm0, %v13_v2, %v11_v1 }
   0xc   :  { %16 = vrot.lane.b32.xlu0 %v15_v4, %s39_s0 }
  0x7e   :  { %v17_v5 = vpop.permute.xlu0 %16  }
  0x7f   :  { %20 = vst.msk [vmem:[#allocation0 + $0x8] sm:$0x1] %vm18_vm2, %v17_v5  }
  0x80   :  { %22 = vst.msk [vmem:[#allocation0] sm:$0x1] %vm21_vm3, %v17_v5  }
  0x86   :  { %v32_v7 = vld [vmem:[#allocation0 + $0x8] sm:$0x1] }
  0x87   :  { %v27_v6 = vld [vmem:[#allocation0] sm:$0x1]  ;;  %37 = vst [vmem:[%s60_s1 + $0x1] sm:$0x1] %v32_v7 }
  0x88   :  { %30 = vst [vmem:[%s60_s1] sm:$0x1] %v27_v6 }

// kernel: tile.6
= control target key start
LH: loop header
LB: loop body
LE: loop exit
PB: predicated region body
PF: predicated region fallthrough
CT: control target
= control target key end

     0   :  { %s22_s0 = inlined_call_operand.vmem [shape: f32[100], index: 0, kind: input, shape index: {}]   ;;  %s23_s1 = inlined_call_operand.vmem [shape: f32[2,1,1,100], index: 1, kind: output, shape index: {}]  }
   0x1   :  { %v4_v0 = vld [vmem:[%s22_s0] ss:$0 sm:$0xff] }
   0x2   :  { %5 = vst [vmem:[%s23_s1] sm:$0x3] %v4_v0 }

// kernel: time_interpolate_forward.5
= control target key start
LH: loop header
LB: loop body
LE: loop exit
PB: predicated region body
PF: predicated region fallthrough
CT: control target
= control target key end

     0   :  { %s550_s15 = smov 0   ;;  %s593_s0 = inlined_call_operand.vmem [shape: f32[4,4,256], index: 0, kind: input, shape index: {}]   ;;  %s594_s1 = inlined_call_operand.vmem [shape: bf16[8,36], index: 1, kind: input, shape index: {}]   ;;  %s595_s2 = inlined_call_operand.vmem [shape: f32[4,1], index: 2, kind: input, shape index: {}]   ;;  %s596_s3 = inlined_call_operand.vmem [shape: f32[1,256], index: 3, kind: input, shape index: {}]   ;;  %s597_s4 = inlined_call_operand.vmem [shape: f32[8,4,256], index: 4, kind: output, shape index: {}]  }
   0x1 LB: > { %s556_s16 = sadd.s32 4294967295, %s514_s15   ;;  %p476_p0 = scmp.ge.s32.totalorder %s514_s15, 1  ;;  %s514_s15 = sphi %s550_s15, %s14_s15  }
   0x2   : > { %p162_p1 = scmp.lt.s32.totalorder %s514_s15, 5 }
   0x4   : > { %p163_p2 = pnand %p476_p0, %p162_p1 }
   0x5   : > { %p189_p3 = scmp.lt.s32.totalorder (!%p163_p2), %s556_s16, 3  ;;  %s516_s22 = smov (!%p163_p2), 127  }
   0x6   : > { %166 = sbr.rel (%p163_p2) target bundleno = 376 (0x178), region = 36  ;;  %s517_s23 = smov (!%p163_p2), 117  }
   0x7   : > { %s518_s24 = smov (!%p163_p2), 118   ;;  %s519_s25 = smov (!%p163_p2), 119  }
   0x8   : > { %s520_s26 = smov (!%p163_p2), 10   ;;  %s521_s27 = smov (!%p163_p2), 1  }
   0x9   : > { %s522_s28 = smov (!%p163_p2), 11   ;;  %s523_s29 = smov (!%p163_p2), 9  }
   0xa   : > { %s479_s8 = sshll.u32 (!%p163_p2), %s556_s16, 1 }
   0xb   : > { %s190_s17 = scalar_select %p189_p3, %s556_s16, 3  ;;  %v524_v2 = vmov 0   ;;  %v376_v3 = vld [vmem:[%s595_s2] sm:$0xf]  ;;  %v210_v4 = vlaneseq  ;;  %vm327_vm5 = vcmask 1041408   ;;  %vm323_vm9 = vcmask 293888  }
   0xc   : > { %366 = vmatprep.mubr.bf16.mxu0 %v524_v2  ;;  %506 = vset.pattern.permute.xlu0 %v524_v2  ;;  %v306_v63 = vld [vmem:[%s594_s1] sm:$0xf]  ;;  %p195_p4 = scmp.lt.s32.totalorder %s479_s8, 7 }
   0xd   : > { %s487_s18 = sshll.u32 %s190_s17, 3  ;;  %v569_v5 = vand.u32 127, %v210_v4 }
   0xe   : > { %s193_s21 = scalar_lea.vmem %s593_s0, %s487_s18  ;;  %s599_s8 = smov (!%p195_p4, %s479_s8), 7 }
   0xf   : > { %v202_v0 = vld [vmem:[%s193_s21] sm:$0xff]  ;;  %vm262_vm0 = vcmp.lt.s32.totalorder %v569_v5, 127  ;;  %vm286_vm1 = vcmp.lt.s32.totalorder %v569_v5, 118  ;;  %vm301_vm2 = vcmp.lt.s32.totalorder %v569_v5, 117  ;;  %vm277_vm3 = vcmp.lt.s32.totalorder %v569_v5, 119  ;;  %s488_s11 = sshll.u32 %s599_s8, 3 }
  0x10   : > { %258 = vrot.lane.b32.xlu1 %v202_v0, %s516_s22  ;;  %256 = vst [vmem:[#allocation2 + $0x48] sm:$0xf] %v202_v0  ;;  %297 = vrot.lane.b32.xlu0 %v202_v0, %s517_s23  ;;  %v204_v1 = vcombine.high %v202_v0, %v202_v0  ;;  %vm221_vm4 = vcmp.lt.s32.totalorder %v569_v5, 10  ;;  %vm245_vm6 = vcmp.lt.s32.totalorder %v569_v5, 1  ;;  %vm212_vm7 = vcmp.lt.s32.totalorder %v569_v5, 11  ;;  %s199_s14 = scalar_lea.vmem %s597_s4, %s488_s11 }
  0x11   : > { %vm236_vm8 = vcmp.lt.s32.totalorder %v569_v5, 9 }
  0x12   : > { %257 = vst [vmem:[#allocation2 + $0x28] sm:$0xf] %v204_v1 }
  0x14   : > { %282 = vrot.lane.b32.xlu0 %v202_v0, %s518_s24  ;;  %260 = vrot.lane.b32.xlu1 %v204_v1, %s516_s22 }
  0x18   : > { %284 = vrot.lane.b32.xlu1 %v204_v1, %s518_s24  ;;  %299 = vrot.lane.b32.xlu0 %v204_v1, %s517_s23 }
  0x1c   : > { %275 = vrot.lane.b32.xlu1 %v204_v1, %s519_s25  ;;  %273 = vrot.lane.b32.xlu0 %v202_v0, %s519_s25 }
  0x20   : > { %219 = vrot.lane.b32.xlu1 %v204_v1, %s520_s26  ;;  %217 = vrot.lane.b32.xlu0 %v202_v0, %s520_s26 }
  0x24   : > { %243 = vrot.lane.b32.xlu1 %v204_v1, %s521_s27  ;;  %241 = vrot.lane.b32.xlu0 %v202_v0, %s521_s27 }
  0x28   : > { %208 = vrot.lane.b32.xlu1 %v204_v1, %s522_s28  ;;  %206 = vrot.lane.b32.xlu0 %v202_v0, %s522_s28 }
  0x2c   : > { %234 = vrot.lane.b32.xlu1 %v204_v1, %s523_s29  ;;  %232 = vrot.lane.b32.xlu0 %v202_v0, %s523_s29  ;;  %v386_v0 = vshrl.u32 %v210_v4, 7 }
  0x2e   : > { %v391_v5 = vsub.s32 1, %v386_v0 }
  0x30   : > { %379 = vperm.xlu0 %506, %v376_v3   ;;  %v387_v3 = vsub.s32 0, %v386_v0 }
  0x82   : > { %v259_v6 = vpop.permute.xlu1 %258  ;;  %v298_v7 = vpop.permute.xlu0 %297 }
  0x86   : > { %v283_v8 = vpop.permute.xlu0 %282  ;;  %v261_v9 = vpop.permute.xlu1 %260 }
  0x87   : > { %v263_v10 = vsel %vm262_vm0, %v259_v6, %v261_v9  ;;  %v264_v11 = vsel %vm262_vm0, %v261_v9, %v259_v6  ;;  %v375_v6 = vld [vmem:[%s596_s3] sm:$0x3] }
  0x88   : > { %v267_v12 = vrot.slane %v263_v10, 4  ;;  %v268_v13 = vrot.slane %v264_v11, 4  ;;  %v388_v9 = vrot.slane %v375_v6, %v387_v3  ;;  %v392_v11 = vrot.slane %v375_v6, %v391_v5 }
  0x8a   : > { %271 = vst [vmem:[#allocation2 + $0x48] sm:$0xf0] %v267_v12  ;;  %272 = vst [vmem:[#allocation2 + $0x28] sm:$0xf0] %v268_v13  ;;  %v285_v14 = vpop.permute.xlu1 %284  ;;  %v300_v15 = vpop.permute.xlu0 %299 }
  0x8b   : > { %v287_v16 = vsel %vm286_vm1, %v283_v8, %v285_v14  ;;  %v288_v17 = vsel %vm286_vm1, %v285_v14, %v283_v8  ;;  %v302_v18 = vsel %vm301_vm2, %v298_v7, %v300_v15  ;;  %v303_v19 = vsel %vm301_vm2, %v300_v15, %v298_v7 }
  0x8c   : > { %v291_v20 = vrot.slane %v287_v16, 4  ;;  %v292_v21 = vrot.slane %v288_v17, 4  ;;  %304 = vst [vmem:[#allocation2 + $0x40] sm:$0xf] %v302_v18  ;;  %305 = vst [vmem:[#allocation2 + $0x38] sm:$0xf] %v303_v19 }
  0x8e   : > { %295 = vst [vmem:[#allocation2 + $0x8] sm:$0xf0] %v291_v20  ;;  %296 = vst [vmem:[#allocation2 + $0x20] sm:$0xf0] %v292_v21  ;;  %v276_v22 = vpop.permute.xlu1 %275  ;;  %v274_v23 = vpop.permute.xlu0 %273 }
  0x8f   : > { %v278_v24 = vsel %vm277_vm3, %v274_v23, %v276_v22  ;;  %v279_v25 = vsel %vm277_vm3, %v276_v22, %v274_v23 }
  0x90   : > { %280 = vst [vmem:[#allocation2 + $0x8] sm:$0xf] %v278_v24  ;;  %281 = vst [vmem:[#allocation2 + $0x20] sm:$0xf] %v279_v25 }
  0x91   : > { %v312_v39 = vld [vmem:[#allocation2 + $0x28] sm:$0xff] }
  0x92   : > { %v220_v26 = vpop.permute.xlu1 %219  ;;  %v218_v27 = vpop.permute.xlu0 %217  ;;  %v311_v43 = vld [vmem:[#allocation2 + $0x48] sm:$0xff] }
  0x93   : > { %v222_v28 = vsel %vm221_vm4, %v218_v27, %v220_v26  ;;  %v223_v29 = vsel %vm221_vm4, %v220_v26, %v218_v27  ;;  %v316_v30 = vld [vmem:[#allocation2 + $0x38] sm:$0xf]  ;;  %v315_v31 = vld [vmem:[#allocation2 + $0x40] sm:$0xf] }
  0x94   : > { %v226_v32 = vrot.slane %v223_v29, 4  ;;  %v227_v33 = vrot.slane %v222_v28, 4  ;;  %v322_v34 = vpack.c.bf16 %v316_v30, %v316_v30  ;;  %v321_v35 = vpack.c.bf16 %v315_v31, %v315_v31 }
  0x96   : > { %230 = vst [vmem:[#allocation2 + $0x30] sm:$0xf0] %v226_v32  ;;  %231 = vst [vmem:[#allocation2] sm:$0xf0] %v227_v33  ;;  %v244_v36 = vpop.permute.xlu1 %243  ;;  %482 = vmatprep.subr.msk.bf16.mxu0 %vm327_vm5, %v322_v34  ;;  %v242_v37 = vpop.permute.xlu0 %241  ;;  %v329_v38 = vsel %vm327_vm5, %v321_v35, 0 }
  0x97   : > { %v246_v40 = vsel %vm245_vm6, %v242_v37, %v244_v36  ;;  %v247_v41 = vsel %vm245_vm6, %v244_v36, %v242_v37  ;;  %345 = vmatpush1.bf16.msra.mxu0 %v329_v38  ;;  %v314_v42 = vld [vmem:[#allocation2 + $0x20] sm:$0xff]  ;;  %v313_v44 = vld [vmem:[#allocation2 + $0x8] sm:$0xff] }
  0x98   : > { %v250_v45 = vrot.slane %v247_v41, 4  ;;  %v251_v46 = vrot.slane %v246_v40, 4  ;;  %v320_v47 = vpack.c.bf16 %v314_v42, %v312_v39  ;;  %v319_v48 = vpack.c.bf16 %v313_v44, %v311_v43 }
  0x9a   : > { %254 = vst [vmem:[#allocation2 + $0x18] sm:$0xf0] %v250_v45  ;;  %255 = vst [vmem:[#allocation2 + $0x10] sm:$0xf0] %v251_v46  ;;  %v209_v49 = vpop.permute.xlu1 %208  ;;  %v207_v50 = vpop.permute.xlu0 %206  ;;  %346 = vmatprep.subr.bf16.mxu0 %v320_v47 }
  0x9b   : > { %v213_v51 = vsel %vm212_vm7, %v207_v50, %v209_v49  ;;  %v214_v52 = vsel %vm212_vm7, %v209_v49, %v207_v50  ;;  %347 = vmatpush1.bf16.msra.mxu0 %v319_v48 }
  0x9c   : > { %215 = vst [vmem:[#allocation2 + $0x30] sm:$0xf] %v214_v52  ;;  %216 = vst [vmem:[#allocation2] sm:$0xf] %v213_v51 }
  0x9e   : > { %v235_v53 = vpop.permute.xlu1 %234  ;;  %v233_v54 = vpop.permute.xlu0 %232 }
  0x9f   : > { %v237_v55 = vsel %vm236_vm8, %v233_v54, %v235_v53  ;;  %v238_v56 = vsel %vm236_vm8, %v235_v53, %v233_v54 }
  0xa0   : > { %239 = vst [vmem:[#allocation2 + $0x18] sm:$0xf] %v238_v56  ;;  %240 = vst [vmem:[#allocation2 + $0x10] sm:$0xf] %v237_v55 }
  0xa3   : > { %v308_v57 = vld [vmem:[#allocation2] sm:$0xff]  ;;  %v307_v59 = vld [vmem:[#allocation2 + $0x30] sm:$0xff] }
  0xa7   : > { %v310_v58 = vld [vmem:[#allocation2 + $0x10] sm:$0xff]  ;;  %v309_v60 = vld [vmem:[#allocation2 + $0x18] sm:$0xff] }
  0xa8   : > { %v318_v61 = vpack.c.bf16 %v310_v58, %v308_v57  ;;  %v317_v62 = vpack.c.bf16 %v309_v60, %v307_v59 }
  0xaa   : > { %348 = vmatprep.subr.bf16.mxu0 %v318_v61 }
  0xab   : > { %349 = vmatpush1.bf16.msra.mxu0 %v317_v62  ;;  %v380_v1 = vpop.permute.xlu0 %379 }
  0xac   : > { %v402_v2 = vrot.slane %v380_v1, 4 }
  0xae   : > { %483 = vmatmul.mubr.msk.bf16.vlgmr.msra.gmra.mxu0 %vm323_vm9, %v306_v63 }
 0x16e   : > { %v368_v7 = vpop.f32.mrf.mxu0 }
 0x16f   : > { %v382_v8 = vadd.f32 %v380_v1, %v368_v7  ;;  %v404_v10 = vadd.f32 %v402_v2, %v368_v7 }
 0x170   : > { %v370_v12 = vpop.f32.mrf.mxu0 }
 0x171   : > { %v383_v13 = vadd.f32 %v380_v1, %v370_v12  ;;  %v405_v14 = vadd.f32 %v402_v2, %v370_v12  ;;  %v395_v15 = vmul.f32 %v388_v9, %v382_v8  ;;  %v406_v16 = vmul.f32 %v404_v10, %v388_v9 }
 0x172   : > { %v372_v4 = vpop.f32.mrf.mxu0 }
 0x173   : > { %v396_v17 = vmul.f32 %v392_v11, %v383_v13  ;;  %v407_v18 = vmul.f32 %v405_v14, %v392_v11 }
 0x174   : > { %v373_v19 = vpop.f32.mrf.mxu0 }
 0x175   : > { %v399_v20 = vcombine.low %v395_v15, %v396_v17  ;;  %v410_v21 = vcombine.high %v406_v16, %v407_v18 }
 0x177   : > { %401 = vst [vmem:[%s199_s14] sm:$0xff] %v399_v20  ;;  %484 = vst [vmem:[%s199_s14 + $0x8] sm:$0xff] %v410_v21 }
 0x178 PF: > { %s14_s15 = sadd.s32 1, %s514_s15  }
 0x179   : > { %p11_p5 = scmp.ge.s32.totalorder %s14_s15, 6  }
 0x17b   :  { %13 = sbr.rel (!%p11_p5) target bundleno = 1 (0x1), region = 67 }

// kernel: time_interpolate_forward.6
= control target key start
LH: loop header
LB: loop body
LE: loop exit
PB: predicated region body
PF: predicated region fallthrough
CT: control target
= control target key end

     0   :  { %s1015_s21 = smov 0   ;;  %s1221_s0 = inlined_call_operand.vmem [shape: f32[8,4,256], index: 0, kind: input, shape index: {}, may-alias: {0,1,2}]   ;;  %s1222_s1 = inlined_call_operand.vmem [shape: f32[8,4,256], index: 1, kind: input, shape index: {}, may-alias: {0,1,2}]   ;;  %s1223_s2 = inlined_call_operand.vmem [shape: f32[8,4,256], index: 2, kind: input, shape index: {}, may-alias: {0,1,2}]   ;;  %s1224_s3 = inlined_call_operand.vmem [shape: bf16[8,108], index: 3, kind: input, shape index: {}]   ;;  %s1225_s4 = inlined_call_operand.vmem [shape: f32[1,256], index: 4, kind: input, shape index: {}]   ;;  %s1226_s5 = inlined_call_operand.vmem [shape: f32[8,8,256], index: 5, kind: output, shape index: {0}]   ;;  %s1227_s6 = inlined_call_operand.vmem [shape: f32[8,8,2], index: 6, kind: output, shape index: {1}]  }
   0x1 LB: > { %s1021_s22 = sadd.s32 4294967295, %s967_s21   ;;  %p907_p0 = scmp.ge.s32.totalorder %s967_s21, 1  ;;  %s967_s21 = sphi %s1015_s21, %s17_s21  }
   0x2   : > { %p259_p1 = scmp.lt.s32.totalorder %s967_s21, 9 }
   0x4   : > { %p260_p2 = pnand %p907_p0, %p259_p1 }
   0x5   : > { %s908_s23 = sadd.s32 (!%p260_p2), 4294967295, %s1021_s22  ;;  %p320_p5 = scmp.lt.s32.totalorder (!%p260_p2), %s1021_s22, 7 }
   0x6   : > { %263 = sbr.rel (%p260_p2) target bundleno = 623 (0x26f), region = 40  ;;  %p310_p3 = scmp.gt.s32.totalorder (!%p260_p2), %s908_s23, 0 }
   0x7   : > { %p909_p4 = scmp.lt.s32.totalorder (!%p260_p2), %s908_s23, 7  ;;  %s325_s28 = sadd.s32 (!%p260_p2), 1, %s1021_s22 }
   0x8   : > { %s969_s29 = smov (!%p260_p2), 10   ;;  %s970_s30 = smov (!%p260_p2), 11  }
   0x9   : > { %p1034_p6 = scmp.lt.s32.totalorder (!%p260_p2), %s325_s28, 7  ;;  %s971_s17 = smov (!%p260_p2), 9  }
   0xa   : > { %s974_s8 = smov (!%p260_p2), 119   ;;  %p926_p7 = scmp.ne.s32.totalorder (!%p260_p2), %s1021_s22, 0 }
   0xb   : > { %s1230_s23 = smov (!%p310_p3, %s908_s23), 0  ;;  %s1234_s28 = smov (!%p1034_p6, %s325_s28), 7  ;;  %v356_v7 = vlaneseq }
   0xc   : > { %s1232_s23 = smov (!%p909_p4, %s1230_s23), 7  ;;  %s1236_s28 = smov (!%p1034_p6, %s1234_s28), 7 }
   0xd   : > { %s934_s24 = sshll.u32 %s1232_s23, 3  ;;  %s972_s23 = smov 1   ;;  %v1099_v8 = vand.u32 127, %v356_v7 }
   0xe   : > { %s316_s27 = scalar_lea.vmem %s1221_s0, %s934_s24  ;;  %s936_s24 = sshll.u32 %s1236_s28, 3 }
   0xf   : > { %v346_v0 = vld [vmem:[%s316_s27] sm:$0xff]  ;;  %s321_s7 = scalar_select %p320_p5, %s1021_s22, 7  ;;  %vm367_vm0 = vcmp.lt.s32.totalorder %v1099_v8, 10  ;;  %vm382_vm1 = vcmp.lt.s32.totalorder %v1099_v8, 9  ;;  %vm391_vm2 = vcmp.lt.s32.totalorder %v1099_v8, 1  ;;  %vm358_vm3 = vcmp.lt.s32.totalorder %v1099_v8, 11 }
  0x10   : > { %363 = vrot.lane.b32.xlu1 %v346_v0, %s969_s29  ;;  %402 = vst [vmem:[#allocation2 + $0x50] sm:$0xf] %v346_v0  ;;  %352 = vrot.lane.b32.xlu0 %v346_v0, %s970_s30  ;;  %v350_v1 = vcombine.high %v346_v0, %v346_v0  ;;  %s332_s27 = scalar_lea.vmem %s1223_s2, %s936_s24  ;;  %s975_s28 = smov 118   ;;  %vm408_vm4 = vcmp.lt.s32.totalorder %v1099_v8, 127  ;;  %vm423_vm5 = vcmp.lt.s32.totalorder %v1099_v8, 119  ;;  %vm432_vm6 = vcmp.lt.s32.totalorder %v1099_v8, 118 }
  0x11   : > { %s935_s9 = sshll.u32 %s321_s7, 3  ;;  %s937_s10 = sshll.u32 %s321_s7, 4  ;;  %v348_v4 = vld [vmem:[%s332_s27] sm:$0xff]  ;;  %vm447_vm7 = vcmp.lt.s32.totalorder %v1099_v8, 117 }
  0x12   : > { %403 = vst [vmem:[#allocation2 + $0x68] sm:$0xf] %v350_v1  ;;  %s324_s13 = scalar_lea.vmem %s1222_s1, %s935_s9  ;;  %s1044_s16 = scalar_lea.vmem %s1226_s5, %s937_s10  ;;  %v548_v5 = vcombine.high %v348_v4, %v348_v4  ;;  %594 = vst [vmem:[#allocation2 + $0x98] sm:$0xf] %v348_v4 }
  0x13   : > { %s1051_s20 = scalar_lea.vmem %s1227_s6, %s935_s9  ;;  %v347_v2 = vld [vmem:[%s324_s13] sm:$0xff]  ;;  %s973_s7 = smov 127  }
  0x14   : > { %378 = vrot.lane.b32.xlu0 %v346_v0, %s971_s17  ;;  %365 = vrot.lane.b32.xlu1 %v350_v1, %s969_s29  ;;  %v499_v3 = vcombine.low %v347_v2, %v347_v2  ;;  %502 = vst [vmem:[#allocation2 + $0x90] sm:$0xf0] %v347_v2  ;;  %595 = vst [vmem:[#allocation2 + $0xa0] sm:$0xf] %v548_v5  ;;  %s976_s9 = smov 117   ;;  %v453_v6 = vcombine.high %v347_v2, %v347_v2 }
  0x16   : > { %501 = vst [vmem:[#allocation2 + $0x38] sm:$0xf0] %v499_v3 }
  0x18   : > { %387 = vrot.lane.b32.xlu0 %v346_v0, %s972_s23  ;;  %380 = vrot.lane.b32.xlu1 %v350_v1, %s971_s17 }
  0x1c   : > { %389 = vrot.lane.b32.xlu1 %v350_v1, %s972_s23  ;;  %354 = vrot.lane.b32.xlu0 %v350_v1, %s970_s30 }
  0x20   : > { %406 = vrot.lane.b32.xlu1 %v350_v1, %s973_s7  ;;  %404 = vrot.lane.b32.xlu0 %v346_v0, %s973_s7 }
  0x24   : > { %421 = vrot.lane.b32.xlu1 %v350_v1, %s974_s8  ;;  %419 = vrot.lane.b32.xlu0 %v346_v0, %s974_s8 }
  0x28   : > { %430 = vrot.lane.b32.xlu1 %v350_v1, %s975_s28  ;;  %428 = vrot.lane.b32.xlu0 %v346_v0, %s975_s28 }
  0x2c   : > { %445 = vrot.lane.b32.xlu1 %v350_v1, %s976_s9  ;;  %443 = vrot.lane.b32.xlu0 %v346_v0, %s976_s9 }
  0x30   : > { %457 = vrot.lane.b32.xlu1 %v453_v6, %s970_s30  ;;  %455 = vrot.lane.b32.xlu0 %v347_v2, %s970_s30 }
  0x34   : > { %479 = vrot.lane.b32.xlu1 %v453_v6, %s971_s17  ;;  %477 = vrot.lane.b32.xlu0 %v347_v2, %s971_s17 }
  0x38   : > { %513 = vrot.lane.b32.xlu1 %v453_v6, %s974_s8  ;;  %511 = vrot.lane.b32.xlu0 %v347_v2, %s974_s8 }
  0x3c   : > { %535 = vrot.lane.b32.xlu1 %v453_v6, %s976_s9  ;;  %533 = vrot.lane.b32.xlu0 %v347_v2, %s976_s9 }
  0x40   : > { %560 = vrot.lane.b32.xlu1 %v548_v5, %s969_s29  ;;  %558 = vrot.lane.b32.xlu0 %v348_v4, %s969_s29 }
  0x44   : > { %582 = vrot.lane.b32.xlu1 %v548_v5, %s972_s23  ;;  %580 = vrot.lane.b32.xlu0 %v348_v4, %s972_s23 }
  0x48   : > { %598 = vrot.lane.b32.xlu1 %v548_v5, %s973_s7  ;;  %596 = vrot.lane.b32.xlu0 %v348_v4, %s973_s7 }
  0x4c   : > { %620 = vrot.lane.b32.xlu1 %v548_v5, %s975_s28  ;;  %618 = vrot.lane.b32.xlu0 %v348_v4, %s975_s28 }
  0x50   : > { %471 = vrot.lane.b32.xlu1 %v453_v6, %s969_s29  ;;  %469 = vrot.lane.b32.xlu0 %v347_v2, %s969_s29 }
  0x54   : > { %493 = vrot.lane.b32.xlu1 %v453_v6, %s972_s23  ;;  %491 = vrot.lane.b32.xlu0 %v347_v2, %s972_s23 }
  0x58   : > { %505 = vrot.lane.b32.xlu1 %v453_v6, %s973_s7  ;;  %503 = vrot.lane.b32.xlu0 %v347_v2, %s973_s7 }
  0x5c   : > { %527 = vrot.lane.b32.xlu1 %v453_v6, %s975_s28  ;;  %525 = vrot.lane.b32.xlu0 %v347_v2, %s975_s28 }
  0x60   : > { %552 = vrot.lane.b32.xlu1 %v548_v5, %s970_s30  ;;  %550 = vrot.lane.b32.xlu0 %v348_v4, %s970_s30 }
  0x64   : > { %574 = vrot.lane.b32.xlu1 %v548_v5, %s971_s17  ;;  %572 = vrot.lane.b32.xlu0 %v348_v4, %s971_s17 }
  0x68   : > { %612 = vrot.lane.b32.xlu1 %v548_v5, %s974_s8  ;;  %610 = vrot.lane.b32.xlu0 %v348_v4, %s974_s8 }
  0x6c   : > { %634 = vrot.lane.b32.xlu1 %v548_v5, %s976_s9  ;;  %632 = vrot.lane.b32.xlu0 %v348_v4, %s976_s9 }
  0x82   : > { %v364_v9 = vpop.permute.xlu1 %363  ;;  %v353_v10 = vpop.permute.xlu0 %352 }
  0x86   : > { %v379_v11 = vpop.permute.xlu0 %378  ;;  %v366_v12 = vpop.permute.xlu1 %365 }
  0x87   : > { %v368_v13 = vsel %vm367_vm0, %v364_v9, %v366_v12  ;;  %v369_v14 = vsel %vm367_vm0, %v366_v12, %v364_v9 }
  0x88   : > { %v372_v15 = vrot.slane %v369_v14, 4  ;;  %v373_v16 = vrot.slane %v368_v13, 4 }
  0x8a   : > { %376 = vst [vmem:[#allocation2 + $0xb0] sm:$0xf0] %v372_v15  ;;  %377 = vst [vmem:[#allocation2] sm:$0xf0] %v373_v16  ;;  %v388_v17 = vpop.permute.xlu0 %387  ;;  %v381_v18 = vpop.permute.xlu1 %380 }
  0x8b   : > { %v383_v19 = vsel %vm382_vm1, %v379_v11, %v381_v18  ;;  %v384_v20 = vsel %vm382_vm1, %v381_v18, %v379_v11 }
  0x8c   : > { %385 = vst [vmem:[#allocation2 + $0xd8] sm:$0xf] %v384_v20  ;;  %386 = vst [vmem:[#allocation2 + $0x18] sm:$0xf] %v383_v19 }
  0x8e   : > { %v390_v21 = vpop.permute.xlu1 %389  ;;  %v355_v22 = vpop.permute.xlu0 %354 }
  0x8f   : > { %v392_v23 = vsel %vm391_vm2, %v388_v17, %v390_v21  ;;  %v393_v24 = vsel %vm391_vm2, %v390_v21, %v388_v17  ;;  %v359_v25 = vsel %vm358_vm3, %v353_v10, %v355_v22  ;;  %v360_v26 = vsel %vm358_vm3, %v355_v22, %v353_v10 }
  0x90   : > { %v396_v27 = vrot.slane %v393_v24, 4  ;;  %v397_v28 = vrot.slane %v392_v23, 4  ;;  %361 = vst [vmem:[#allocation2 + $0xb0] sm:$0xf] %v360_v26  ;;  %362 = vst [vmem:[#allocation2] sm:$0xf] %v359_v25 }
  0x92   : > { %400 = vst [vmem:[#allocation2 + $0xd8] sm:$0xf0] %v396_v27  ;;  %401 = vst [vmem:[#allocation2 + $0x18] sm:$0xf0] %v397_v28  ;;  %v407_v29 = vpop.permute.xlu1 %406  ;;  %v405_v30 = vpop.permute.xlu0 %404 }
  0x93   : > { %v409_v31 = vsel %vm408_vm4, %v405_v30, %v407_v29  ;;  %v410_v32 = vsel %vm408_vm4, %v407_v29, %v405_v30 }
  0x94   : > { %v413_v33 = vrot.slane %v409_v31, 4  ;;  %v414_v34 = vrot.slane %v410_v32, 4 }
  0x96   : > { %417 = vst [vmem:[#allocation2 + $0x50] sm:$0xf0] %v413_v33  ;;  %418 = vst [vmem:[#allocation2 + $0x68] sm:$0xf0] %v414_v34  ;;  %v422_v35 = vpop.permute.xlu1 %421  ;;  %v420_v36 = vpop.permute.xlu0 %419 }
  0x97   : > { %v424_v37 = vsel %vm423_vm5, %v420_v36, %v422_v35  ;;  %v425_v38 = vsel %vm423_vm5, %v422_v35, %v420_v36 }
  0x98   : > { %426 = vst [vmem:[#allocation2 + $0x30] sm:$0xf] %v424_v37  ;;  %427 = vst [vmem:[#allocation2 + $0x48] sm:$0xf] %v425_v38 }
  0x9a   : > { %v431_v39 = vpop.permute.xlu1 %430  ;;  %v429_v40 = vpop.permute.xlu0 %428 }
  0x9b   : > { %v433_v41 = vsel %vm432_vm6, %v429_v40, %v431_v39  ;;  %v434_v42 = vsel %vm432_vm6, %v431_v39, %v429_v40 }
  0x9c   : > { %v437_v43 = vrot.slane %v433_v41, 4  ;;  %v438_v44 = vrot.slane %v434_v42, 4 }
  0x9e   : > { %441 = vst [vmem:[#allocation2 + $0x30] sm:$0xf0] %v437_v43  ;;  %442 = vst [vmem:[#allocation2 + $0x48] sm:$0xf0] %v438_v44  ;;  %v446_v45 = vpop.permute.xlu1 %445  ;;  %v444_v46 = vpop.permute.xlu0 %443 }
  0x9f   : > { %v448_v47 = vsel %vm447_vm7, %v444_v46, %v446_v45  ;;  %v449_v48 = vsel %vm447_vm7, %v446_v45, %v444_v46 }
  0xa0   : > { %450 = vst [vmem:[#allocation2 + $0x80] sm:$0xf] %v448_v47  ;;  %451 = vst [vmem:[#allocation2 + $0x88] sm:$0xf] %v449_v48 }
  0xa2   : > { %v458_v49 = vpop.permute.xlu1 %457  ;;  %v456_v50 = vpop.permute.xlu0 %455 }
  0xa3   : > { %v459_v51 = vsel %vm358_vm3, %v456_v50, %v458_v49  ;;  %v460_v52 = vsel %vm358_vm3, %v458_v49, %v456_v50 }
  0xa4   : > { %v463_v53 = vrot.slane %v460_v52, 4  ;;  %v464_v54 = vrot.slane %v459_v51, 4 }
  0xa6   : > { %467 = vst [vmem:[#allocation2 + $0x80] sm:$0xf0] %v463_v53  ;;  %468 = vst [vmem:[#allocation2 + $0x88] sm:$0xf0] %v464_v54  ;;  %v480_v55 = vpop.permute.xlu1 %479  ;;  %v478_v56 = vpop.permute.xlu0 %477 }
  0xa7   : > { %v481_v57 = vsel %vm382_vm1, %v478_v56, %v480_v55  ;;  %v482_v58 = vsel %vm382_vm1, %v480_v55, %v478_v56 }
  0xa8   : > { %v485_v59 = vrot.slane %v482_v58, 4  ;;  %v486_v60 = vrot.slane %v481_v57, 4 }
  0xaa   : > { %489 = vst [vmem:[#allocation2 + $0x8] sm:$0xf0] %v485_v59  ;;  %490 = vst [vmem:[#allocation2 + $0x58] sm:$0xf0] %v486_v60  ;;  %v514_v61 = vpop.permute.xlu1 %513  ;;  %v512_v62 = vpop.permute.xlu0 %511 }
  0xab   : > { %v515_v63 = vsel %vm423_vm5, %v512_v62, %v514_v61  ;;  %v516_v0 = vsel %vm423_vm5, %v514_v61, %v512_v62 }
  0xac   : > { %v519_v1 = vrot.slane %v515_v63, 4  ;;  %v520_v2 = vrot.slane %v516_v0, 4 }
  0xae   : > { %523 = vst [vmem:[#allocation2 + $0x78] sm:$0xf0] %v519_v1  ;;  %524 = vst [vmem:[#allocation2 + $0xb8] sm:$0xf0] %v520_v2  ;;  %v536_v3 = vpop.permute.xlu1 %535  ;;  %v534_v4 = vpop.permute.xlu0 %533 }
  0xaf   : > { %v537_v5 = vsel %vm447_vm7, %v534_v4, %v536_v3  ;;  %v538_v6 = vsel %vm447_vm7, %v536_v3, %v534_v4 }
  0xb0   : > { %v541_v9 = vrot.slane %v537_v5, 4  ;;  %v542_v10 = vrot.slane %v538_v6, 4 }
  0xb2   : > { %545 = vst [vmem:[#allocation2 + $0x40] sm:$0xf0] %v541_v9  ;;  %546 = vst [vmem:[#allocation2 + $0x28] sm:$0xf0] %v542_v10  ;;  %v561_v11 = vpop.permute.xlu1 %560  ;;  %v559_v12 = vpop.permute.xlu0 %558 }
  0xb3   : > { %v562_v13 = vsel %vm367_vm0, %v559_v12, %v561_v11  ;;  %v563_v14 = vsel %vm367_vm0, %v561_v11, %v559_v12 }
  0xb4   : > { %v566_v15 = vrot.slane %v563_v14, 4  ;;  %v567_v16 = vrot.slane %v562_v13, 4 }
  0xb6   : > { %570 = vst [vmem:[#allocation2 + $0xc0] sm:$0xf0] %v566_v15  ;;  %571 = vst [vmem:[#allocation2 + $0x60] sm:$0xf0] %v567_v16  ;;  %v583_v17 = vpop.permute.xlu1 %582  ;;  %v581_v18 = vpop.permute.xlu0 %580 }
  0xb7   : > { %v584_v19 = vsel %vm391_vm2, %v581_v18, %v583_v17  ;;  %v585_v20 = vsel %vm391_vm2, %v583_v17, %v581_v18 }
  0xb8   : > { %v588_v21 = vrot.slane %v585_v20, 4  ;;  %v589_v22 = vrot.slane %v584_v19, 4 }
  0xba   : > { %592 = vst [vmem:[#allocation2 + $0xd0] sm:$0xf0] %v588_v21  ;;  %593 = vst [vmem:[#allocation2 + $0xa8] sm:$0xf0] %v589_v22  ;;  %v599_v23 = vpop.permute.xlu1 %598  ;;  %v597_v24 = vpop.permute.xlu0 %596 }
  0xbb   : > { %v600_v25 = vsel %vm408_vm4, %v597_v24, %v599_v23  ;;  %v601_v26 = vsel %vm408_vm4, %v599_v23, %v597_v24 }
  0xbc   : > { %v604_v27 = vrot.slane %v600_v25, 4  ;;  %v605_v28 = vrot.slane %v601_v26, 4 }
  0xbe   : > { %608 = vst [vmem:[#allocation2 + $0x98] sm:$0xf0] %v604_v27  ;;  %609 = vst [vmem:[#allocation2 + $0xa0] sm:$0xf0] %v605_v28  ;;  %v621_v29 = vpop.permute.xlu1 %620  ;;  %v619_v30 = vpop.permute.xlu0 %618 }
  0xbf   : > { %v622_v31 = vsel %vm432_vm6, %v619_v30, %v621_v29  ;;  %v623_v32 = vsel %vm432_vm6, %v621_v29, %v619_v30 }
  0xc0   : > { %v626_v33 = vrot.slane %v622_v31, 4  ;;  %v627_v34 = vrot.slane %v623_v32, 4 }
  0xc2   : > { %630 = vst [vmem:[#allocation2 + $0x20] sm:$0xf0] %v626_v33  ;;  %631 = vst [vmem:[#allocation2 + $0x10] sm:$0xf0] %v627_v34  ;;  %v472_v35 = vpop.permute.xlu1 %471  ;;  %v470_v36 = vpop.permute.xlu0 %469 }
  0xc3   : > { %v473_v37 = vsel %vm367_vm0, %v470_v36, %v472_v35  ;;  %v474_v38 = vsel %vm367_vm0, %v472_v35, %v470_v36 }
  0xc4   : > { %475 = vst [vmem:[#allocation2 + $0x8] sm:$0xf] %v474_v38  ;;  %476 = vst [vmem:[#allocation2 + $0x58] sm:$0xf] %v473_v37 }
  0xc6   : > { %v494_v39 = vpop.permute.xlu1 %493  ;;  %v492_v40 = vpop.permute.xlu0 %491 }
  0xc7   : > { %v495_v41 = vsel %vm391_vm2, %v492_v40, %v494_v39  ;;  %v496_v42 = vsel %vm391_vm2, %v494_v39, %v492_v40 }
  0xc8   : > { %497 = vst [vmem:[#allocation2 + $0x38] sm:$0xf] %v496_v42  ;;  %498 = vst [vmem:[#allocation2 + $0x90] sm:$0xf] %v495_v41 }
  0xca   : > { %v506_v43 = vpop.permute.xlu1 %505  ;;  %v504_v44 = vpop.permute.xlu0 %503 }
  0xcb   : > { %v507_v45 = vsel %vm408_vm4, %v504_v44, %v506_v43  ;;  %v508_v46 = vsel %vm408_vm4, %v506_v43, %v504_v44 }
  0xcc   : > { %509 = vst [vmem:[#allocation2 + $0x78] sm:$0xf] %v507_v45  ;;  %510 = vst [vmem:[#allocation2 + $0xb8] sm:$0xf] %v508_v46 }
  0xce   : > { %v528_v47 = vpop.permute.xlu1 %527  ;;  %v526_v48 = vpop.permute.xlu0 %525 }
  0xcf   : > { %v529_v49 = vsel %vm432_vm6, %v526_v48, %v528_v47  ;;  %v530_v50 = vsel %vm432_vm6, %v528_v47, %v526_v48 }
  0xd0   : > { %531 = vst [vmem:[#allocation2 + $0x40] sm:$0xf] %v529_v49  ;;  %532 = vst [vmem:[#allocation2 + $0x28] sm:$0xf] %v530_v50 }
  0xd2   : > { %v553_v51 = vpop.permute.xlu1 %552  ;;  %v551_v52 = vpop.permute.xlu0 %550 }
  0xd3   : > { %v554_v53 = vsel %vm358_vm3, %v551_v52, %v553_v51  ;;  %v555_v54 = vsel %vm358_vm3, %v553_v51, %v551_v52 }
  0xd4   : > { %556 = vst [vmem:[#allocation2 + $0xc0] sm:$0xf] %v555_v54  ;;  %557 = vst [vmem:[#allocation2 + $0x60] sm:$0xf] %v554_v53 }
  0xd6   : > { %v575_v55 = vpop.permute.xlu1 %574  ;;  %v573_v56 = vpop.permute.xlu0 %572 }
  0xd7   : > { %v576_v57 = vsel %vm382_vm1, %v573_v56, %v575_v55  ;;  %v577_v58 = vsel %vm382_vm1, %v575_v55, %v573_v56 }
  0xd8   : > { %578 = vst [vmem:[#allocation2 + $0xd0] sm:$0xf] %v577_v58  ;;  %579 = vst [vmem:[#allocation2 + $0xa8] sm:$0xf] %v576_v57 }
  0xda   : > { %v613_v59 = vpop.permute.xlu1 %612  ;;  %v611_v60 = vpop.permute.xlu0 %610 }
  0xdb   : > { %v614_v61 = vsel %vm423_vm5, %v611_v60, %v613_v59  ;;  %v615_v62 = vsel %vm423_vm5, %v613_v59, %v611_v60 }
  0xdc   : > { %616 = vst [vmem:[#allocation2 + $0x20] sm:$0xf] %v614_v61  ;;  %617 = vst [vmem:[#allocation2 + $0x10] sm:$0xf] %v615_v62  ;;  %643 = sbr.rel (%p926_p7) target bundleno = 231 (0xe7), region = 44 }
  0xde   : > { %v635_v63 = vpop.permute.xlu1 %634  ;;  %v633_v0 = vpop.permute.xlu0 %632 }
  0xdf   : > { %v636_v1 = vsel %vm447_vm7, %v633_v0, %v635_v63  ;;  %v637_v2 = vsel %vm447_vm7, %v635_v63, %v633_v0 }
  0xe0   : > { %638 = vst [vmem:[#allocation2 + $0xc8] sm:$0xf] %v636_v1  ;;  %639 = vst [vmem:[#allocation2 + $0x70] sm:$0xf] %v637_v2 }
  0xe1   : > { %v977_v3 = vmov 0.0  }
  0xe2   : > { %644 = vst [vmem:[#allocation2 + $0xb0] sm:$0xff] %v977_v3  ;;  %645 = vst [vmem:[#allocation2] sm:$0xff] %v977_v3 }
  0xe3   : > { %646 = vst [vmem:[#allocation2 + $0xd8] sm:$0xff] %v977_v3  ;;  %647 = vst [vmem:[#allocation2 + $0x18] sm:$0xff] %v977_v3 }
  0xe4   : > { %648 = vst [vmem:[#allocation2 + $0x50] sm:$0xff] %v977_v3  ;;  %649 = vst [vmem:[#allocation2 + $0x68] sm:$0xff] %v977_v3 }
  0xe5   : > { %650 = vst [vmem:[#allocation2 + $0x30] sm:$0xff] %v977_v3  ;;  %651 = vst [vmem:[#allocation2 + $0x48] sm:$0xff] %v977_v3 }
  0xe6   : > { %652 = vst [vmem:[#allocation2 + $0x80] sm:$0xf] %v977_v3  ;;  %653 = vst [vmem:[#allocation2 + $0x88] sm:$0xf] %v977_v3 }
  0xe7 PF: > { %p927_p8 = scmp.ne.s32.totalorder %s1021_s22, 7 }
  0xe9   : > { %657 = sbr.rel (%p927_p8) target bundleno = 244 (0xf4), region = 48 }
  0xee   : > { %v978_v8 = vmov 0.0  }
  0xef   : > { %658 = vst [vmem:[#allocation2 + $0xc0] sm:$0xff] %v978_v8  ;;  %659 = vst [vmem:[#allocation2 + $0x60] sm:$0xff] %v978_v8 }
  0xf0   : > { %660 = vst [vmem:[#allocation2 + $0xd0] sm:$0xff] %v978_v8  ;;  %661 = vst [vmem:[#allocation2 + $0xa8] sm:$0xff] %v978_v8 }
  0xf1   : > { %662 = vst [vmem:[#allocation2 + $0x98] sm:$0xff] %v978_v8  ;;  %663 = vst [vmem:[#allocation2 + $0xa0] sm:$0xff] %v978_v8 }
  0xf2   : > { %664 = vst [vmem:[#allocation2 + $0x20] sm:$0xff] %v978_v8  ;;  %665 = vst [vmem:[#allocation2 + $0x10] sm:$0xff] %v978_v8 }
  0xf3   : > { %666 = vst [vmem:[#allocation2 + $0xc8] sm:$0xf] %v978_v8  ;;  %667 = vst [vmem:[#allocation2 + $0x70] sm:$0xf] %v978_v8 }
  0xf4 PF: > { %vm715_vm8 = vcmask 1045504   ;;  %v979_v13 = vmov 0   ;;  %v686_v18 = vld [vmem:[#allocation2 + $0x28] sm:$0xff]  ;;  %v685_v23 = vld [vmem:[#allocation2 + $0x40] sm:$0xff]  ;;  %v682_v25 = vld [vmem:[#allocation2 + $0x90] sm:$0xff]  ;;  %vm711_vm9 = vcmask 883712  }
  0xf5   : > { %754 = vmatprep.mubr.bf16.mxu0 %v979_v13  ;;  %v684_v26 = vld [vmem:[#allocation2 + $0xb8] sm:$0xff]  ;;  %v678_v31 = vld [vmem:[#allocation2 + $0x88] sm:$0xff]  ;;  %v677_v35 = vld [vmem:[#allocation2 + $0x80] sm:$0xff]  ;;  %v768_v51 = vshrl.u32 %v356_v7, 7  ;;  %vm782_vm10 = vcmask 7168   ;;  %vm789_vm11 = vcmask 15368  }
  0xf6   : > { %v688_v19 = vld [vmem:[#allocation2 + $0x60] sm:$0xff]  ;;  %v704_v28 = vpack.c.bf16 %v684_v26, %v682_v25  ;;  %v681_v29 = vld [vmem:[#allocation2 + $0x38] sm:$0xff]  ;;  %v679_v36 = vld [vmem:[#allocation2 + $0x8] sm:$0xff] }
  0xf7   : > { %v690_v11 = vld [vmem:[#allocation2 + $0xa8] sm:$0xff]  ;;  %v689_v16 = vld [vmem:[#allocation2 + $0xd0] sm:$0xff]  ;;  %v706_v22 = vpack.c.bf16 %v688_v19, %v686_v18  ;;  %v687_v24 = vld [vmem:[#allocation2 + $0xc0] sm:$0xff]  ;;  %v701_v39 = vpack.c.bf16 %v679_v36, %v677_v35  ;;  %v769_v52 = vsub.s32 0, %v768_v51  ;;  %v773_v53 = vsub.s32 1, %v768_v51 }
  0xf8   : > { %v692_v12 = vld [vmem:[#allocation2 + $0xa0] sm:$0xff]  ;;  %v691_v17 = vld [vmem:[#allocation2 + $0x98] sm:$0xff]  ;;  %v705_v27 = vpack.c.bf16 %v687_v24, %v685_v23  ;;  %v674_v37 = vld [vmem:[#allocation2 + $0x68] sm:$0xff] }
  0xf9   : > { %v694_v4 = vld [vmem:[#allocation2 + $0x10] sm:$0xff]  ;;  %v693_v6 = vld [vmem:[#allocation2 + $0x20] sm:$0xff]  ;;  %v708_v15 = vpack.c.bf16 %v692_v12, %v690_v11  ;;  %v707_v21 = vpack.c.bf16 %v691_v17, %v689_v16  ;;  %v683_v30 = vld [vmem:[#allocation2 + $0x78] sm:$0xff] }
  0xfa   : > { %v696_v5 = vld [vmem:[#allocation2 + $0x70] sm:$0xf]  ;;  %v695_v10 = vld [vmem:[#allocation2 + $0xc8] sm:$0xf]  ;;  %v680_v32 = vld [vmem:[#allocation2 + $0x58] sm:$0xff]  ;;  %v703_v33 = vpack.c.bf16 %v683_v30, %v681_v29 }
  0xfb   : > { %v710_v9 = vpack.c.bf16 %v696_v5, %v694_v4  ;;  %v709_v14 = vpack.c.bf16 %v695_v10, %v693_v6  ;;  %v702_v34 = vpack.c.bf16 %v680_v32, %v678_v31  ;;  %v676_v38 = vld [vmem:[#allocation2 + $0x48] sm:$0xff]  ;;  %v673_v41 = vld [vmem:[#allocation2 + $0x50] sm:$0xff]  ;;  %v670_v43 = vld [vmem:[#allocation2] sm:$0xff] }
  0xfc   : > { %v700_v40 = vpack.c.bf16 %v676_v38, %v674_v37  ;;  %v675_v42 = vld [vmem:[#allocation2 + $0x30] sm:$0xff]  ;;  %v672_v44 = vld [vmem:[#allocation2 + $0x18] sm:$0xff]  ;;  %v668_v50 = vld [vmem:[%s1224_s3] sm:$0xf] }
  0xfd   : > { %928 = vmatprep.subr.msk.bf16.mxu0 %vm715_vm8, %v710_v9  ;;  %v717_v20 = vsel %vm715_vm8, %v709_v14, 0  ;;  %v699_v45 = vpack.c.bf16 %v675_v42, %v673_v41  ;;  %v698_v46 = vpack.c.bf16 %v672_v44, %v670_v43  ;;  %v669_v47 = vld [vmem:[#allocation2 + $0xb0] sm:$0xff]  ;;  %v671_v48 = vld [vmem:[#allocation2 + $0xd8] sm:$0xff]  ;;  %v765_v54 = vld [vmem:[%s1225_s4] sm:$0x3] }
  0xfe   : > { %725 = vmatpush1.bf16.msra.mxu0 %v717_v20  ;;  %v697_v49 = vpack.c.bf16 %v671_v48, %v669_v47  ;;  %v770_v55 = vrot.slane %v765_v54, %v769_v52  ;;  %v774_v56 = vrot.slane %v765_v54, %v773_v53 }
  0xff   : > { %726 = vmatprep.subr.bf16.mxu0 %v708_v15 }
 0x102   : > { %727 = vmatpush1.bf16.msra.mxu0 %v707_v21 }
 0x103   : > { %728 = vmatprep.subr.bf16.mxu0 %v706_v22 }
 0x106   : > { %729 = vmatpush1.bf16.msra.mxu0 %v705_v27 }
 0x107   : > { %730 = vmatprep.subr.bf16.mxu0 %v704_v28 }
 0x10a   : > { %731 = vmatpush1.bf16.msra.mxu0 %v703_v33 }
 0x10b   : > { %732 = vmatprep.subr.bf16.mxu0 %v702_v34 }
 0x10e   : > { %733 = vmatpush1.bf16.msra.mxu0 %v701_v39 }
 0x10f   : > { %734 = vmatprep.subr.bf16.mxu0 %v700_v40 }
 0x112   : > { %735 = vmatpush1.bf16.msra.mxu0 %v699_v45 }
 0x113   : > { %736 = vmatprep.subr.bf16.mxu0 %v698_v46 }
 0x116   : > { %737 = vmatpush1.bf16.msra.mxu0 %v697_v49 }
 0x119   : > { %929 = vmatmul.mubr.msk.bf16.vlgmr.msra.gmra.mxu0 %vm711_vm9, %v668_v50 }
 0x1d9   : > { %v756_v57 = vpop.f32.mrf.mxu0 }
 0x1da   : > { %763 = vst [vmem:[%s1044_s16] sm:$0xff] %v756_v57  ;;  %v777_v59 = vmul.f32 %v770_v55, %v756_v57 }
 0x1db   : > { %v758_v58 = vpop.f32.mrf.mxu0 }
 0x1dc   : > { %764 = vst [vmem:[%s1044_s16 + $0x8] sm:$0xff] %v758_v58  ;;  %v778_v60 = vmul.f32 %v774_v56, %v758_v58  ;;  %v784_v0 = vmul.f32 %v777_v59, %v756_v57 }
 0x1dd   : > { %v760_v61 = vpop.f32.mrf.mxu0 }
 0x1de   : > { %v779_v62 = vadd.f32 %v778_v60, %v777_v59  ;;  %v785_v63 = vmul.f32 %v778_v60, %v758_v58 }
 0x1df   : > { %v761_v7 = vpop.f32.mrf.mxu0 }
 0x1e0   : > { %780 = vadd.xlane.f32.xlu0 %v779_v62  ;;  %v786_v1 = vadd.f32 %v785_v63, %v784_v0 }
 0x1e4   : > { %787 = vadd.xlane.f32.xlu0 %v786_v1 }
 0x269   : > { %v781_v2 = vpop.xlane.xlu0 %780 }
 0x26a   : > { %783 = vst.msk [vmem:[%s1051_s20] sm:$0xff] %vm782_vm10, %v781_v2 }
 0x26d   : > { %v788_v3 = vpop.xlane.xlu0 %787 }
 0x26e   : > { %790 = vst.msk [vmem:[%s1051_s20] sm:$0xff] %vm789_vm11, %v788_v3 }
 0x26f PF: > { %s17_s21 = sadd.s32 1, %s967_s21  }
 0x270   : > { %p14_p9 = scmp.ge.s32.totalorder %s17_s21, 10  }
 0x272   :  { %16 = sbr.rel (!%p14_p9) target bundleno = 1 (0x1), region = 96 }

// kernel: time_interpolate_forward.7
= control target key start
LH: loop header
LB: loop body
LE: loop exit
PB: predicated region body
PF: predicated region fallthrough
CT: control target
= control target key end

     0   :  { %s346_s15 = smov 0   ;;  %s372_s0 = inlined_call_operand.vmem [shape: f32[8,8,256], index: 0, kind: input, shape index: {}]   ;;  %s373_s1 = inlined_call_operand.vmem [shape: f32[8,1], index: 1, kind: input, shape index: {}]   ;;  %s374_s2 = inlined_call_operand.vmem [shape: f32[8,1], index: 2, kind: input, shape index: {}]   ;;  %s375_s3 = inlined_call_operand.vmem [shape: f32[1,256], index: 3, kind: input, shape index: {}]   ;;  %s376_s4 = inlined_call_operand.vmem [shape: f32[8,8,256], index: 4, kind: output, shape index: {}]  }
   0x1 LB: > { %s289_s16 = sadd.s32 4294967295, %s318_s15   ;;  %p293_p0 = scmp.ge.s32.totalorder %s318_s15, 1  ;;  %s318_s15 = sphi %s346_s15, %s14_s15  }
   0x2   : > { %p162_p1 = scmp.lt.s32.totalorder %s318_s15, 9 }
   0x4   : > { %p163_p2 = pnand %p293_p0, %p162_p1 }
   0x5   : > { %p188_p3 = scmp.lt.s32.totalorder (!%p163_p2), %s289_s16, 7 }
   0x6   : > { %166 = sbr.rel (%p163_p2) target bundleno = 148 (0x94), region = 36 }
   0xb   : > { %v200_v0 = vld [vmem:[%s373_s1] sm:$0xff]  ;;  %v320_v1 = vmov 0   ;;  %s378_s16 = smov (!%p188_p3, %s289_s16), 7  ;;  %v220_v3 = vlaneseq }
   0xc   : > { %311 = vset.pattern.permute.xlu0 %v320_v1  ;;  %v208_v2 = vld [vmem:[%s374_s2] sm:$0xff]  ;;  %s300_s21 = sshll.u32 %s378_s16, 4 }
   0xd   : > { %203 = vperm.xlu0 %311, %v200_v0   ;;  %s192_s24 = scalar_lea.vmem %s372_s0, %s300_s21  ;;  %v221_v4 = vshrl.u32 %v220_v3, 7  ;;  %v218_v10 = vld [vmem:[%s375_s3] sm:$0x3]  ;;  %s197_s29 = scalar_lea.vmem %s376_s4, %s300_s21 }
   0xe   : > { %v198_v6 = vld [vmem:[%s192_s24] sm:$0xff]  ;;  %v199_v7 = vld [vmem:[%s192_s24 + $0x8] sm:$0xff] }
   0xf   : > { %v222_v8 = vsub.s32 0, %v221_v4  ;;  %v226_v9 = vsub.s32 1, %v221_v4 }
  0x11   : > { %211 = vperm.xlu0 %311, %v208_v2   ;;  %v223_v14 = vrot.slane %v218_v10, %v222_v8  ;;  %v227_v15 = vrot.slane %v218_v10, %v226_v9 }
  0x88   : > { %v204_v5 = vpop.permute.xlu0 %203 }
  0x89   : > { %v206_v11 = vmul.f32 %v204_v5, %v198_v6  ;;  %v207_v12 = vmul.f32 %v204_v5, %v199_v7 }
  0x8c   : > { %v212_v13 = vpop.permute.xlu0 %211 }
  0x8d   : > { %v214_v16 = vadd.f32 %v212_v13, %v206_v11  ;;  %v215_v17 = vadd.f32 %v212_v13, %v207_v12 }
  0x8f   : > { %v216_v18 = vmax.f32 %v214_v16, 0.0  ;;  %v217_v19 = vmax.f32 %v215_v17, 0.0 }
  0x91   : > { %v230_v20 = vmul.f32 %v223_v14, %v216_v18  ;;  %v231_v21 = vmul.f32 %v227_v15, %v217_v19 }
  0x93   : > { %232 = vst [vmem:[%s197_s29] sm:$0xff] %v230_v20  ;;  %233 = vst [vmem:[%s197_s29 + $0x8] sm:$0xff] %v231_v21 }
  0x94 PF: > { %s14_s15 = sadd.s32 1, %s318_s15  }
  0x95   : > { %p11_p4 = scmp.ge.s32.totalorder %s14_s15, 10  }
  0x97   :  { %13 = sbr.rel (!%p11_p4) target bundleno = 1 (0x1), region = 66 }

// kernel: time_interpolate_forward.8
= control target key start
LH: loop header
LB: loop body
LE: loop exit
PB: predicated region body
PF: predicated region fallthrough
CT: control target
= control target key end

     0   :  { %s995_s21 = smov 0   ;;  %s1213_s0 = inlined_call_operand.vmem [shape: f32[8,8,256], index: 0, kind: input, shape index: {}, may-alias: {0,1,2}]   ;;  %s1214_s1 = inlined_call_operand.vmem [shape: f32[8,8,256], index: 1, kind: input, shape index: {}, may-alias: {0,1,2}]   ;;  %s1215_s2 = inlined_call_operand.vmem [shape: f32[8,8,256], index: 2, kind: input, shape index: {}, may-alias: {0,1,2}]   ;;  %s1216_s3 = inlined_call_operand.vmem [shape: bf16[8,216], index: 3, kind: input, shape index: {}]   ;;  %s1217_s4 = inlined_call_operand.vmem [shape: f32[1,256], index: 4, kind: input, shape index: {}]   ;;  %s1218_s5 = inlined_call_operand.vmem [shape: f32[8,8,256], index: 5, kind: output, shape index: {0}]   ;;  %s1219_s6 = inlined_call_operand.vmem [shape: f32[8,8,2], index: 6, kind: output, shape index: {1}]  }
   0x1 LB: > { %s1001_s22 = sadd.s32 4294967295, %s948_s21   ;;  %p889_p0 = scmp.ge.s32.totalorder %s948_s21, 1  ;;  %s948_s21 = sphi %s995_s21, %s17_s21  }
   0x2   : > { %p259_p1 = scmp.lt.s32.totalorder %s948_s21, 9 }
   0x4   : > { %p260_p2 = pnand %p889_p0, %p259_p1 }
   0x5   : > { %s890_s23 = sadd.s32 (!%p260_p2), 4294967295, %s1001_s22  ;;  %p320_p5 = scmp.lt.s32.totalorder (!%p260_p2), %s1001_s22, 7 }
   0x6   : > { %263 = sbr.rel (%p260_p2) target bundleno = 653 (0x28d), region = 40  ;;  %p310_p3 = scmp.gt.s32.totalorder (!%p260_p2), %s890_s23, 0 }
   0x7   : > { %p891_p4 = scmp.lt.s32.totalorder (!%p260_p2), %s890_s23, 7  ;;  %s325_s28 = sadd.s32 (!%p260_p2), 1, %s1001_s22 }
   0x8   : > { %s950_s29 = smov (!%p260_p2), 10   ;;  %s951_s30 = smov (!%p260_p2), 11  }
   0x9   : > { %p1014_p6 = scmp.lt.s32.totalorder (!%p260_p2), %s325_s28, 7  ;;  %s952_s20 = smov (!%p260_p2), 9  }
   0xa   : > { %s955_s8 = smov (!%p260_p2), 119   ;;  %p908_p7 = scmp.ne.s32.totalorder (!%p260_p2), %s1001_s22, 0 }
   0xb   : > { %s1222_s23 = smov (!%p310_p3, %s890_s23), 0  ;;  %s1226_s28 = smov (!%p1014_p6, %s325_s28), 7  ;;  %v356_v6 = vlaneseq }
   0xc   : > { %s1224_s23 = smov (!%p891_p4, %s1222_s23), 7  ;;  %s1228_s28 = smov (!%p1014_p6, %s1226_s28), 7 }
   0xd   : > { %s918_s24 = sshll.u32 %s1224_s23, 4  ;;  %s920_s23 = sshll.u32 %s1228_s28, 4  ;;  %v1085_v7 = vand.u32 127, %v356_v6 }
   0xe   : > { %s316_s27 = scalar_lea.vmem %s1213_s0, %s918_s24  ;;  %s332_s26 = scalar_lea.vmem %s1215_s2, %s920_s23 }
   0xf   : > { %v346_v0 = vld [vmem:[%s316_s27] sm:$0xff]  ;;  %v347_v1 = vld [vmem:[%s316_s27 + $0x8] sm:$0xff]  ;;  %s321_s7 = scalar_select %p320_p5, %s1001_s22, 7  ;;  %vm367_vm0 = vcmp.lt.s32.totalorder %v1085_v7, 10  ;;  %vm358_vm1 = vcmp.lt.s32.totalorder %v1085_v7, 11  ;;  %vm376_vm2 = vcmp.lt.s32.totalorder %v1085_v7, 9 }
  0x10   : > { %363 = vrot.lane.b32.xlu1 %v346_v0, %s950_s29  ;;  %390 = vst [vmem:[#allocation2 + $0x108] sm:$0xff] %v346_v0  ;;  %352 = vrot.lane.b32.xlu0 %v346_v0, %s951_s30  ;;  %391 = vst [vmem:[#allocation2 + $0x110] sm:$0xff] %v347_v1  ;;  %v351_v4 = vld [vmem:[%s332_s26 + $0x8] sm:$0xff]  ;;  %v350_v5 = vld [vmem:[%s332_s26] sm:$0xff]  ;;  %s953_s27 = smov 1   ;;  %s956_s28 = smov 118  }
  0x11   : > { %s919_s9 = sshll.u32 %s321_s7, 4  ;;  %s907_s10 = sshll.u32 %s321_s7, 3  ;;  %527 = vst [vmem:[#allocation2 + $0x60] sm:$0xff] %v351_v4  ;;  %526 = vst [vmem:[#allocation2 + $0x8] sm:$0xff] %v350_v5  ;;  %vm385_vm3 = vcmp.lt.s32.totalorder %v1085_v7, 1  ;;  %vm396_vm4 = vcmp.lt.s32.totalorder %v1085_v7, 127 }
  0x12   : > { %s324_s13 = scalar_lea.vmem %s1214_s1, %s919_s9  ;;  %s1024_s16 = scalar_lea.vmem %s1218_s5, %s919_s9  ;;  %vm405_vm5 = vcmp.lt.s32.totalorder %v1085_v7, 119  ;;  %vm414_vm6 = vcmp.lt.s32.totalorder %v1085_v7, 118  ;;  %vm423_vm7 = vcmp.lt.s32.totalorder %v1085_v7, 117 }
  0x13   : > { %s1031_s19 = scalar_lea.vmem %s1219_s6, %s907_s10  ;;  %v349_v2 = vld [vmem:[%s324_s13 + $0x8] sm:$0xff]  ;;  %v348_v3 = vld [vmem:[%s324_s13] sm:$0xff]  ;;  %s954_s7 = smov 127  }
  0x14   : > { %365 = vrot.lane.b32.xlu1 %v347_v1, %s950_s29  ;;  %354 = vrot.lane.b32.xlu0 %v347_v1, %s951_s30  ;;  %461 = vst [vmem:[#allocation2] sm:$0xff] %v349_v2  ;;  %460 = vst [vmem:[#allocation2 + $0x28] sm:$0xff] %v348_v3  ;;  %s957_s9 = smov 117  }
  0x18   : > { %374 = vrot.lane.b32.xlu1 %v347_v1, %s952_s20  ;;  %372 = vrot.lane.b32.xlu0 %v346_v0, %s952_s20 }
  0x1c   : > { %383 = vrot.lane.b32.xlu1 %v347_v1, %s953_s27  ;;  %381 = vrot.lane.b32.xlu0 %v346_v0, %s953_s27 }
  0x20   : > { %394 = vrot.lane.b32.xlu1 %v347_v1, %s954_s7  ;;  %392 = vrot.lane.b32.xlu0 %v346_v0, %s954_s7 }
  0x24   : > { %403 = vrot.lane.b32.xlu1 %v347_v1, %s955_s8  ;;  %401 = vrot.lane.b32.xlu0 %v346_v0, %s955_s8 }
  0x28   : > { %412 = vrot.lane.b32.xlu1 %v347_v1, %s956_s28  ;;  %410 = vrot.lane.b32.xlu0 %v346_v0, %s956_s28 }
  0x2c   : > { %421 = vrot.lane.b32.xlu1 %v347_v1, %s957_s9  ;;  %419 = vrot.lane.b32.xlu0 %v346_v0, %s957_s9 }
  0x30   : > { %430 = vrot.lane.b32.xlu1 %v349_v2, %s951_s30  ;;  %428 = vrot.lane.b32.xlu0 %v348_v3, %s951_s30 }
  0x34   : > { %438 = vrot.lane.b32.xlu1 %v349_v2, %s950_s29  ;;  %436 = vrot.lane.b32.xlu0 %v348_v3, %s950_s29 }
  0x38   : > { %446 = vrot.lane.b32.xlu1 %v349_v2, %s952_s20  ;;  %444 = vrot.lane.b32.xlu0 %v348_v3, %s952_s20 }
  0x3c   : > { %454 = vrot.lane.b32.xlu1 %v349_v2, %s953_s27  ;;  %452 = vrot.lane.b32.xlu0 %v348_v3, %s953_s27 }
  0x40   : > { %464 = vrot.lane.b32.xlu1 %v349_v2, %s954_s7  ;;  %462 = vrot.lane.b32.xlu0 %v348_v3, %s954_s7 }
  0x44   : > { %472 = vrot.lane.b32.xlu1 %v349_v2, %s955_s8  ;;  %470 = vrot.lane.b32.xlu0 %v348_v3, %s955_s8 }
  0x48   : > { %480 = vrot.lane.b32.xlu1 %v349_v2, %s956_s28  ;;  %478 = vrot.lane.b32.xlu0 %v348_v3, %s956_s28 }
  0x4c   : > { %488 = vrot.lane.b32.xlu1 %v349_v2, %s957_s9  ;;  %486 = vrot.lane.b32.xlu0 %v348_v3, %s957_s9 }
  0x50   : > { %496 = vrot.lane.b32.xlu1 %v351_v4, %s951_s30  ;;  %494 = vrot.lane.b32.xlu0 %v350_v5, %s951_s30 }
  0x54   : > { %504 = vrot.lane.b32.xlu1 %v351_v4, %s950_s29  ;;  %502 = vrot.lane.b32.xlu0 %v350_v5, %s950_s29 }
  0x58   : > { %512 = vrot.lane.b32.xlu1 %v351_v4, %s952_s20  ;;  %510 = vrot.lane.b32.xlu0 %v350_v5, %s952_s20 }
  0x5c   : > { %520 = vrot.lane.b32.xlu1 %v351_v4, %s953_s27  ;;  %518 = vrot.lane.b32.xlu0 %v350_v5, %s953_s27 }
  0x60   : > { %530 = vrot.lane.b32.xlu1 %v351_v4, %s954_s7  ;;  %528 = vrot.lane.b32.xlu0 %v350_v5, %s954_s7 }
  0x64   : > { %538 = vrot.lane.b32.xlu1 %v351_v4, %s955_s8  ;;  %536 = vrot.lane.b32.xlu0 %v350_v5, %s955_s8 }
  0x68   : > { %546 = vrot.lane.b32.xlu1 %v351_v4, %s956_s28  ;;  %544 = vrot.lane.b32.xlu0 %v350_v5, %s956_s28 }
  0x6c   : > { %554 = vrot.lane.b32.xlu1 %v351_v4, %s957_s9  ;;  %552 = vrot.lane.b32.xlu0 %v350_v5, %s957_s9 }
  0x82   : > { %v364_v8 = vpop.permute.xlu1 %363  ;;  %v353_v9 = vpop.permute.xlu0 %352 }
  0x86   : > { %v366_v10 = vpop.permute.xlu1 %365  ;;  %v355_v11 = vpop.permute.xlu0 %354 }
  0x87   : > { %v368_v12 = vsel %vm367_vm0, %v364_v8, %v366_v10  ;;  %v369_v13 = vsel %vm367_vm0, %v366_v10, %v364_v8  ;;  %v359_v14 = vsel %vm358_vm1, %v353_v9, %v355_v11  ;;  %v360_v15 = vsel %vm358_vm1, %v355_v11, %v353_v9 }
  0x88   : > { %370 = vst [vmem:[#allocation2 + $0x10] sm:$0xff] %v369_v13  ;;  %371 = vst [vmem:[#allocation2 + $0x48] sm:$0xff] %v368_v12 }
  0x89   : > { %361 = vst [vmem:[#allocation2 + $0xb0] sm:$0xff] %v360_v15  ;;  %362 = vst [vmem:[#allocation2 + $0xd0] sm:$0xff] %v359_v14 }
  0x8a   : > { %v375_v16 = vpop.permute.xlu1 %374  ;;  %v373_v17 = vpop.permute.xlu0 %372 }
  0x8b   : > { %v377_v18 = vsel %vm376_vm2, %v373_v17, %v375_v16  ;;  %v378_v19 = vsel %vm376_vm2, %v375_v16, %v373_v17 }
  0x8c   : > { %379 = vst [vmem:[#allocation2 + $0x160] sm:$0xff] %v378_v19  ;;  %380 = vst [vmem:[#allocation2 + $0x128] sm:$0xff] %v377_v18 }
  0x8e   : > { %v384_v20 = vpop.permute.xlu1 %383  ;;  %v382_v21 = vpop.permute.xlu0 %381 }
  0x8f   : > { %v386_v22 = vsel %vm385_vm3, %v382_v21, %v384_v20  ;;  %v387_v23 = vsel %vm385_vm3, %v384_v20, %v382_v21 }
  0x90   : > { %388 = vst [vmem:[#allocation2 + $0x40] sm:$0xff] %v387_v23  ;;  %389 = vst [vmem:[#allocation2 + $0x178] sm:$0xff] %v386_v22 }
  0x92   : > { %v395_v24 = vpop.permute.xlu1 %394  ;;  %v393_v25 = vpop.permute.xlu0 %392 }
  0x93   : > { %v397_v26 = vsel %vm396_vm4, %v393_v25, %v395_v24  ;;  %v398_v27 = vsel %vm396_vm4, %v395_v24, %v393_v25 }
  0x94   : > { %399 = vst [vmem:[#allocation2 + $0x90] sm:$0xff] %v397_v26  ;;  %400 = vst [vmem:[#allocation2 + $0x118] sm:$0xff] %v398_v27 }
  0x96   : > { %v404_v28 = vpop.permute.xlu1 %403  ;;  %v402_v29 = vpop.permute.xlu0 %401 }
  0x97   : > { %v406_v30 = vsel %vm405_vm5, %v402_v29, %v404_v28  ;;  %v407_v31 = vsel %vm405_vm5, %v404_v28, %v402_v29 }
  0x98   : > { %408 = vst [vmem:[#allocation2 + $0x148] sm:$0xff] %v406_v30  ;;  %409 = vst [vmem:[#allocation2 + $0x100] sm:$0xff] %v407_v31 }
  0x9a   : > { %v413_v32 = vpop.permute.xlu1 %412  ;;  %v411_v33 = vpop.permute.xlu0 %410 }
  0x9b   : > { %v415_v34 = vsel %vm414_vm6, %v411_v33, %v413_v32  ;;  %v416_v35 = vsel %vm414_vm6, %v413_v32, %v411_v33 }
  0x9c   : > { %417 = vst [vmem:[#allocation2 + $0x58] sm:$0xff] %v415_v34  ;;  %418 = vst [vmem:[#allocation2 + $0xd8] sm:$0xff] %v416_v35 }
  0x9e   : > { %v422_v36 = vpop.permute.xlu1 %421  ;;  %v420_v37 = vpop.permute.xlu0 %419 }
  0x9f   : > { %v424_v38 = vsel %vm423_vm7, %v420_v37, %v422_v36  ;;  %v425_v39 = vsel %vm423_vm7, %v422_v36, %v420_v37 }
  0xa0   : > { %426 = vst [vmem:[#allocation2 + $0x180] sm:$0xff] %v424_v38  ;;  %427 = vst [vmem:[#allocation2 + $0x130] sm:$0xff] %v425_v39 }
  0xa2   : > { %v431_v40 = vpop.permute.xlu1 %430  ;;  %v429_v41 = vpop.permute.xlu0 %428 }
  0xa3   : > { %v432_v42 = vsel %vm358_vm1, %v429_v41, %v431_v40  ;;  %v433_v43 = vsel %vm358_vm1, %v431_v40, %v429_v41 }
  0xa4   : > { %434 = vst [vmem:[#allocation2 + $0x138] sm:$0xff] %v433_v43  ;;  %435 = vst [vmem:[#allocation2 + $0x78] sm:$0xff] %v432_v42 }
  0xa6   : > { %v439_v44 = vpop.permute.xlu1 %438  ;;  %v437_v45 = vpop.permute.xlu0 %436 }
  0xa7   : > { %v440_v46 = vsel %vm367_vm0, %v437_v45, %v439_v44  ;;  %v441_v47 = vsel %vm367_vm0, %v439_v44, %v437_v45 }
  0xa8   : > { %442 = vst [vmem:[#allocation2 + $0x1a0] sm:$0xff] %v441_v47  ;;  %443 = vst [vmem:[#allocation2 + $0x158] sm:$0xff] %v440_v46 }
  0xaa   : > { %v447_v48 = vpop.permute.xlu1 %446  ;;  %v445_v49 = vpop.permute.xlu0 %444 }
  0xab   : > { %v448_v50 = vsel %vm376_vm2, %v445_v49, %v447_v48  ;;  %v449_v51 = vsel %vm376_vm2, %v447_v48, %v445_v49 }
  0xac   : > { %450 = vst [vmem:[#allocation2 + $0x98] sm:$0xff] %v449_v51  ;;  %451 = vst [vmem:[#allocation2 + $0xe8] sm:$0xff] %v448_v50 }
  0xae   : > { %v455_v52 = vpop.permute.xlu1 %454  ;;  %v453_v53 = vpop.permute.xlu0 %452 }
  0xaf   : > { %v456_v54 = vsel %vm385_vm3, %v453_v53, %v455_v52  ;;  %v457_v55 = vsel %vm385_vm3, %v455_v52, %v453_v53 }
  0xb0   : > { %458 = vst [vmem:[#allocation2 + $0x80] sm:$0xff] %v457_v55  ;;  %459 = vst [vmem:[#allocation2 + $0xa8] sm:$0xff] %v456_v54 }
  0xb2   : > { %v465_v56 = vpop.permute.xlu1 %464  ;;  %v463_v57 = vpop.permute.xlu0 %462 }
  0xb3   : > { %v466_v58 = vsel %vm396_vm4, %v463_v57, %v465_v56  ;;  %v467_v59 = vsel %vm396_vm4, %v465_v56, %v463_v57 }
  0xb4   : > { %468 = vst [vmem:[#allocation2 + $0x168] sm:$0xff] %v466_v58  ;;  %469 = vst [vmem:[#allocation2 + $0xb8] sm:$0xff] %v467_v59 }
  0xb6   : > { %v473_v60 = vpop.permute.xlu1 %472  ;;  %v471_v61 = vpop.permute.xlu0 %470 }
  0xb7   : > { %v474_v62 = vsel %vm405_vm5, %v471_v61, %v473_v60  ;;  %v475_v63 = vsel %vm405_vm5, %v473_v60, %v471_v61 }
  0xb8   : > { %476 = vst [vmem:[#allocation2 + $0x1a8] sm:$0xff] %v474_v62  ;;  %477 = vst [vmem:[#allocation2 + $0x140] sm:$0xff] %v475_v63 }
  0xba   : > { %v481_v0 = vpop.permute.xlu1 %480  ;;  %v479_v1 = vpop.permute.xlu0 %478 }
  0xbb   : > { %v482_v2 = vsel %vm414_vm6, %v479_v1, %v481_v0  ;;  %v483_v3 = vsel %vm414_vm6, %v481_v0, %v479_v1 }
  0xbc   : > { %484 = vst [vmem:[#allocation2 + $0x50] sm:$0xff] %v482_v2  ;;  %485 = vst [vmem:[#allocation2 + $0xa0] sm:$0xff] %v483_v3 }
  0xbe   : > { %v489_v4 = vpop.permute.xlu1 %488  ;;  %v487_v5 = vpop.permute.xlu0 %486 }
  0xbf   : > { %v490_v8 = vsel %vm423_vm7, %v487_v5, %v489_v4  ;;  %v491_v9 = vsel %vm423_vm7, %v489_v4, %v487_v5 }
  0xc0   : > { %492 = vst [vmem:[#allocation2 + $0x170] sm:$0xff] %v490_v8  ;;  %493 = vst [vmem:[#allocation2 + $0x198] sm:$0xff] %v491_v9 }
  0xc2   : > { %v497_v10 = vpop.permute.xlu1 %496  ;;  %v495_v11 = vpop.permute.xlu0 %494 }
  0xc3   : > { %v498_v12 = vsel %vm358_vm1, %v495_v11, %v497_v10  ;;  %v499_v13 = vsel %vm358_vm1, %v497_v10, %v495_v11 }
  0xc4   : > { %500 = vst [vmem:[#allocation2 + $0xc0] sm:$0xff] %v499_v13  ;;  %501 = vst [vmem:[#allocation2 + $0x190] sm:$0xff] %v498_v12 }
  0xc6   : > { %v505_v14 = vpop.permute.xlu1 %504  ;;  %v503_v15 = vpop.permute.xlu0 %502 }
  0xc7   : > { %v506_v16 = vsel %vm367_vm0, %v503_v15, %v505_v14  ;;  %v507_v17 = vsel %vm367_vm0, %v505_v14, %v503_v15 }
  0xc8   : > { %508 = vst [vmem:[#allocation2 + $0xc8] sm:$0xff] %v507_v17  ;;  %509 = vst [vmem:[#allocation2 + $0xf0] sm:$0xff] %v506_v16 }
  0xca   : > { %v513_v18 = vpop.permute.xlu1 %512  ;;  %v511_v19 = vpop.permute.xlu0 %510 }
  0xcb   : > { %v514_v20 = vsel %vm376_vm2, %v511_v19, %v513_v18  ;;  %v515_v21 = vsel %vm376_vm2, %v513_v18, %v511_v19 }
  0xcc   : > { %516 = vst [vmem:[#allocation2 + $0x150] sm:$0xff] %v515_v21  ;;  %517 = vst [vmem:[#allocation2 + $0x30] sm:$0xff] %v514_v20 }
  0xce   : > { %v521_v22 = vpop.permute.xlu1 %520  ;;  %v519_v23 = vpop.permute.xlu0 %518 }
  0xcf   : > { %v522_v24 = vsel %vm385_vm3, %v519_v23, %v521_v22  ;;  %v523_v25 = vsel %vm385_vm3, %v521_v22, %v519_v23 }
  0xd0   : > { %524 = vst [vmem:[#allocation2 + $0xf8] sm:$0xff] %v523_v25  ;;  %525 = vst [vmem:[#allocation2 + $0x18] sm:$0xff] %v522_v24 }
  0xd2   : > { %v531_v26 = vpop.permute.xlu1 %530  ;;  %v529_v27 = vpop.permute.xlu0 %528 }
  0xd3   : > { %v532_v28 = vsel %vm396_vm4, %v529_v27, %v531_v26  ;;  %v533_v29 = vsel %vm396_vm4, %v531_v26, %v529_v27 }
  0xd4   : > { %534 = vst [vmem:[#allocation2 + $0x70] sm:$0xff] %v532_v28  ;;  %535 = vst [vmem:[#allocation2 + $0x68] sm:$0xff] %v533_v29 }
  0xd6   : > { %v539_v30 = vpop.permute.xlu1 %538  ;;  %v537_v31 = vpop.permute.xlu0 %536 }
  0xd7   : > { %v540_v32 = vsel %vm405_vm5, %v537_v31, %v539_v30  ;;  %v541_v33 = vsel %vm405_vm5, %v539_v30, %v537_v31 }
  0xd8   : > { %542 = vst [vmem:[#allocation2 + $0x38] sm:$0xff] %v540_v32  ;;  %543 = vst [vmem:[#allocation2 + $0x20] sm:$0xff] %v541_v33 }
  0xda   : > { %v547_v34 = vpop.permute.xlu1 %546  ;;  %v545_v35 = vpop.permute.xlu0 %544 }
  0xdb   : > { %v548_v36 = vsel %vm414_vm6, %v545_v35, %v547_v34  ;;  %v549_v37 = vsel %vm414_vm6, %v547_v34, %v545_v35 }
  0xdc   : > { %550 = vst [vmem:[#allocation2 + $0x88] sm:$0xff] %v548_v36  ;;  %551 = vst [vmem:[#allocation2 + $0xe0] sm:$0xff] %v549_v37  ;;  %563 = sbr.rel (%p908_p7) target bundleno = 235 (0xeb), region = 44 }
  0xde   : > { %v555_v38 = vpop.permute.xlu1 %554  ;;  %v553_v39 = vpop.permute.xlu0 %552 }
  0xdf   : > { %v556_v40 = vsel %vm423_vm7, %v553_v39, %v555_v38  ;;  %v557_v41 = vsel %vm423_vm7, %v555_v38, %v553_v39 }
  0xe0   : > { %558 = vst [vmem:[#allocation2 + $0x120] sm:$0xff] %v556_v40  ;;  %559 = vst [vmem:[#allocation2 + $0x188] sm:$0xff] %v557_v41 }
  0xe1   : > { %v958_v42 = vmov 0.0  }
  0xe2   : > { %564 = vst [vmem:[#allocation2 + $0xb0] sm:$0xff] %v958_v42  ;;  %565 = vst [vmem:[#allocation2 + $0xd0] sm:$0xff] %v958_v42 }
  0xe3   : > { %566 = vst [vmem:[#allocation2 + $0x10] sm:$0xff] %v958_v42  ;;  %567 = vst [vmem:[#allocation2 + $0x48] sm:$0xff] %v958_v42 }
  0xe4   : > { %568 = vst [vmem:[#allocation2 + $0x160] sm:$0xff] %v958_v42  ;;  %569 = vst [vmem:[#allocation2 + $0x128] sm:$0xff] %v958_v42 }
  0xe5   : > { %570 = vst [vmem:[#allocation2 + $0x40] sm:$0xff] %v958_v42  ;;  %571 = vst [vmem:[#allocation2 + $0x178] sm:$0xff] %v958_v42 }
  0xe6   : > { %572 = vst [vmem:[#allocation2 + $0x108] sm:$0xff] %v958_v42  ;;  %573 = vst [vmem:[#allocation2 + $0x110] sm:$0xff] %v958_v42 }
  0xe7   : > { %574 = vst [vmem:[#allocation2 + $0x90] sm:$0xff] %v958_v42  ;;  %575 = vst [vmem:[#allocation2 + $0x118] sm:$0xff] %v958_v42 }
  0xe8   : > { %576 = vst [vmem:[#allocation2 + $0x148] sm:$0xff] %v958_v42  ;;  %577 = vst [vmem:[#allocation2 + $0x100] sm:$0xff] %v958_v42 }
  0xe9   : > { %578 = vst [vmem:[#allocation2 + $0x58] sm:$0xff] %v958_v42  ;;  %579 = vst [vmem:[#allocation2 + $0xd8] sm:$0xff] %v958_v42 }
  0xea   : > { %580 = vst [vmem:[#allocation2 + $0x180] sm:$0xff] %v958_v42  ;;  %581 = vst [vmem:[#allocation2 + $0x130] sm:$0xff] %v958_v42 }
  0xeb PF: > { %p909_p8 = scmp.ne.s32.totalorder %s1001_s22, 7 }
  0xed   : > { %585 = sbr.rel (%p909_p8) target bundleno = 252 (0xfc), region = 48 }
  0xf2   : > { %v959_v7 = vmov 0.0  }
  0xf3   : > { %586 = vst [vmem:[#allocation2 + $0xc0] sm:$0xff] %v959_v7  ;;  %587 = vst [vmem:[#allocation2 + $0x190] sm:$0xff] %v959_v7 }
  0xf4   : > { %588 = vst [vmem:[#allocation2 + $0xc8] sm:$0xff] %v959_v7  ;;  %589 = vst [vmem:[#allocation2 + $0xf0] sm:$0xff] %v959_v7 }
  0xf5   : > { %590 = vst [vmem:[#allocation2 + $0x150] sm:$0xff] %v959_v7  ;;  %591 = vst [vmem:[#allocation2 + $0x30] sm:$0xff] %v959_v7 }
  0xf6   : > { %592 = vst [vmem:[#allocation2 + $0xf8] sm:$0xff] %v959_v7  ;;  %593 = vst [vmem:[#allocation2 + $0x18] sm:$0xff] %v959_v7 }
  0xf7   : > { %594 = vst [vmem:[#allocation2 + $0x8] sm:$0xff] %v959_v7  ;;  %595 = vst [vmem:[#allocation2 + $0x60] sm:$0xff] %v959_v7 }
  0xf8   : > { %596 = vst [vmem:[#allocation2 + $0x70] sm:$0xff] %v959_v7  ;;  %597 = vst [vmem:[#allocation2 + $0x68] sm:$0xff] %v959_v7 }
  0xf9   : > { %598 = vst [vmem:[#allocation2 + $0x38] sm:$0xff] %v959_v7  ;;  %599 = vst [vmem:[#allocation2 + $0x20] sm:$0xff] %v959_v7 }
  0xfa   : > { %600 = vst [vmem:[#allocation2 + $0x88] sm:$0xff] %v959_v7  ;;  %601 = vst [vmem:[#allocation2 + $0xe0] sm:$0xff] %v959_v7 }
  0xfb   : > { %602 = vst [vmem:[#allocation2 + $0x120] sm:$0xff] %v959_v7  ;;  %603 = vst [vmem:[#allocation2 + $0x188] sm:$0xff] %v959_v7 }
  0xfc PF: > { %v634_v43 = vld [vmem:[#allocation2 + $0xb8] sm:$0xff]  ;;  %v636_v44 = vld [vmem:[#allocation2 + $0x140] sm:$0xff]  ;;  %v633_v45 = vld [vmem:[#allocation2 + $0x168] sm:$0xff]  ;;  %vm693_vm8 = vcmask 719872   ;;  %vm697_vm9 = vcmask 1043456   ;;  %vm764_vm10 = vcmask 7168  }
  0xfd   : > { %v674_v46 = vpack.c.bf16 %v636_v44, %v634_v43  ;;  %v635_v47 = vld [vmem:[#allocation2 + $0x1a8] sm:$0xff]  ;;  %v632_v49 = vld [vmem:[#allocation2] sm:$0xff]  ;;  %v626_v54 = vld [vmem:[#allocation2 + $0x158] sm:$0xff]  ;;  %vm771_vm11 = vcmask 15368  }
  0xfe   : > { %v630_v48 = vld [vmem:[#allocation2 + $0xa8] sm:$0xff]  ;;  %v673_v50 = vpack.c.bf16 %v635_v47, %v633_v45  ;;  %v629_v52 = vld [vmem:[#allocation2 + $0x80] sm:$0xff]  ;;  %v627_v59 = vld [vmem:[#allocation2 + $0x98] sm:$0xff] }
  0xff   : > { %v672_v51 = vpack.c.bf16 %v632_v49, %v630_v48  ;;  %v631_v53 = vld [vmem:[#allocation2 + $0x28] sm:$0xff]  ;;  %704 = vmatprep.subr.bf16.mxu0 %v674_v46  ;;  %v625_v58 = vld [vmem:[#allocation2 + $0x1a0] sm:$0xff]  ;;  %v622_v60 = vld [vmem:[#allocation2 + $0x130] sm:$0xff] }
 0x100   : > { %v628_v55 = vld [vmem:[#allocation2 + $0xe8] sm:$0xff]  ;;  %705 = vmatpush1.bf16.msra.mxu0 %v673_v50  ;;  %v671_v56 = vpack.c.bf16 %v631_v53, %v629_v52  ;;  %v624_v61 = vld [vmem:[#allocation2 + $0x78] sm:$0xff]  ;;  %v669_v62 = vpack.c.bf16 %v627_v59, %v625_v58  ;;  %v621_v0 = vld [vmem:[#allocation2 + $0x180] sm:$0xff] }
 0x101   : > { %706 = vmatprep.subr.bf16.mxu0 %v672_v51  ;;  %v670_v57 = vpack.c.bf16 %v628_v55, %v626_v54  ;;  %v668_v63 = vpack.c.bf16 %v624_v61, %v622_v60  ;;  %v623_v1 = vld [vmem:[#allocation2 + $0x138] sm:$0xff]  ;;  %v618_v2 = vld [vmem:[#allocation2 + $0x100] sm:$0xff]  ;;  %v617_v8 = vld [vmem:[#allocation2 + $0x148] sm:$0xff] }
 0x102   : > { %v620_v3 = vld [vmem:[#allocation2 + $0xd8] sm:$0xff]  ;;  %v667_v4 = vpack.c.bf16 %v623_v1, %v621_v0  ;;  %v614_v10 = vld [vmem:[#allocation2 + $0x110] sm:$0xff]  ;;  %v613_v14 = vld [vmem:[#allocation2 + $0x108] sm:$0xff] }
 0x103   : > { %v666_v5 = vpack.c.bf16 %v620_v3, %v618_v2  ;;  %v619_v9 = vld [vmem:[#allocation2 + $0x58] sm:$0xff]  ;;  %v615_v15 = vld [vmem:[#allocation2 + $0x90] sm:$0xff]  ;;  %v610_v16 = vld [vmem:[#allocation2 + $0x128] sm:$0xff]  ;;  %v750_v2 = vshrl.u32 %v356_v6, 7 }
 0x104   : > { %707 = vmatpush1.bf16.msra.mxu0 %v671_v56  ;;  %v616_v11 = vld [vmem:[#allocation2 + $0x118] sm:$0xff]  ;;  %v665_v12 = vpack.c.bf16 %v619_v9, %v617_v8  ;;  %v1196_v18 = vld [vmem:[%s1216_s3] sm:$0xff]  ;;  %v663_v20 = vpack.c.bf16 %v615_v15, %v613_v14  ;;  %v606_v24 = vld [vmem:[#allocation2 + $0xd0] sm:$0xff] }
 0x105   : > { %708 = vmatprep.subr.bf16.mxu0 %v670_v57  ;;  %v664_v13 = vpack.c.bf16 %v616_v11, %v614_v10  ;;  %v612_v17 = vld [vmem:[#allocation2 + $0x178] sm:$0xff]  ;;  %v911_v19 = vcombine.high %v1196_v18, %v1196_v18  ;;  %v609_v22 = vld [vmem:[#allocation2 + $0x160] sm:$0xff]  ;;  %v608_v25 = vld [vmem:[#allocation2 + $0x48] sm:$0xff]  ;;  %v910_v1 = vcombine.low %v1196_v18, %v1196_v18  ;;  %v751_v3 = vsub.s32 0, %v750_v2 }
 0x106   : > { %v662_v21 = vpack.c.bf16 %v612_v17, %v610_v16  ;;  %v611_v23 = vld [vmem:[#allocation2 + $0x40] sm:$0xff]  ;;  %v660_v27 = vpack.c.bf16 %v608_v25, %v606_v24  ;;  %v605_v28 = vld [vmem:[#allocation2 + $0xb0] sm:$0xff]  ;;  %v658_v30 = vld [vmem:[#allocation2 + $0x188] sm:$0xff] }
 0x107   : > { %913 = vmatprep.mubr.msk.bf16.mxu0 %vm693_vm8, %v911_v19  ;;  %v661_v26 = vpack.c.bf16 %v611_v23, %v609_v22  ;;  %v607_v29 = vld [vmem:[#allocation2 + $0x10] sm:$0xff]  ;;  %v657_v31 = vld [vmem:[#allocation2 + $0x120] sm:$0xff]  ;;  %v686_v33 = vpack.c.bf16 %v658_v30, %v658_v30  ;;  %v653_v39 = vld [vmem:[#allocation2 + $0x38] sm:$0xff] }
 0x108   : > { %709 = vmatpush1.bf16.msra.mxu0 %v669_v62  ;;  %v659_v32 = vpack.c.bf16 %v607_v29, %v605_v28  ;;  %v685_v34 = vpack.c.bf16 %v657_v31, %v657_v31  ;;  %v654_v35 = vld [vmem:[#allocation2 + $0x20] sm:$0xff]  ;;  %v655_v40 = vld [vmem:[#allocation2 + $0x88] sm:$0xff]  ;;  %v651_v45 = vld [vmem:[#allocation2 + $0x70] sm:$0xff] }
 0x109   : > { %710 = vmatprep.subr.bf16.mxu0 %v668_v63  ;;  %v656_v36 = vld [vmem:[#allocation2 + $0xe0] sm:$0xff]  ;;  %v652_v42 = vld [vmem:[#allocation2 + $0x68] sm:$0xff]  ;;  %v683_v7 = vpack.c.bf16 %v655_v40, %v653_v39  ;;  %v646_v46 = vld [vmem:[#allocation2 + $0x30] sm:$0xff] }
 0x10a   : > { %v699_v37 = vsel %vm697_vm9, %v685_v34, 0  ;;  %v684_v38 = vpack.c.bf16 %v656_v36, %v654_v35  ;;  %v650_v41 = vld [vmem:[#allocation2 + $0x60] sm:$0xff]  ;;  %v649_v44 = vld [vmem:[#allocation2 + $0x8] sm:$0xff]  ;;  %v648_v47 = vld [vmem:[#allocation2 + $0x18] sm:$0xff] }
 0x10b   : > { %v682_v43 = vpack.c.bf16 %v652_v42, %v650_v41  ;;  %v681_v48 = vpack.c.bf16 %v651_v45, %v649_v44  ;;  %v680_v49 = vpack.c.bf16 %v648_v47, %v646_v46  ;;  %v645_v50 = vld [vmem:[#allocation2 + $0x150] sm:$0xff]  ;;  %v647_v51 = vld [vmem:[#allocation2 + $0xf8] sm:$0xff]  ;;  %v641_v56 = vld [vmem:[#allocation2 + $0xc0] sm:$0xff] }
 0x10c   : > { %711 = vmatpush1.bf16.msra.mxu0 %v667_v4  ;;  %v642_v52 = vld [vmem:[#allocation2 + $0x190] sm:$0xff]  ;;  %v679_v54 = vpack.c.bf16 %v647_v51, %v645_v50  ;;  %v643_v57 = vld [vmem:[#allocation2 + $0xc8] sm:$0xff]  ;;  %v638_v58 = vld [vmem:[#allocation2 + $0xa0] sm:$0xff]  ;;  %v755_v4 = vsub.s32 1, %v750_v2 }
 0x10d   : > { %712 = vmatprep.subr.bf16.mxu0 %v666_v5  ;;  %v644_v53 = vld [vmem:[#allocation2 + $0xf0] sm:$0xff]  ;;  %v640_v59 = vld [vmem:[#allocation2 + $0x198] sm:$0xff]  ;;  %v677_v60 = vpack.c.bf16 %v643_v57, %v641_v56  ;;  %v747_v5 = vld [vmem:[%s1217_s4] sm:$0x3] }
 0x10e   : > { %v678_v55 = vpack.c.bf16 %v644_v53, %v642_v52  ;;  %v676_v61 = vpack.c.bf16 %v640_v59, %v638_v58  ;;  %v637_v62 = vld [vmem:[#allocation2 + $0x50] sm:$0xff]  ;;  %v752_v8 = vrot.slane %v747_v5, %v751_v3  ;;  %v756_v9 = vrot.slane %v747_v5, %v755_v4 }
 0x10f   : > { %v639_v63 = vld [vmem:[#allocation2 + $0x170] sm:$0xff] }
 0x110   : > { %713 = vmatpush1.bf16.msra.mxu0 %v665_v12  ;;  %v675_v0 = vpack.c.bf16 %v639_v63, %v637_v62 }
 0x111   : > { %714 = vmatprep.subr.bf16.mxu0 %v664_v13 }
 0x114   : > { %715 = vmatpush1.bf16.msra.mxu0 %v663_v20 }
 0x115   : > { %716 = vmatprep.subr.bf16.mxu0 %v662_v21 }
 0x118   : > { %717 = vmatpush1.bf16.msra.mxu0 %v661_v26 }
 0x119   : > { %718 = vmatprep.subr.bf16.mxu0 %v660_v27 }
 0x11c   : > { %719 = vmatpush1.bf16.msra.mxu0 %v659_v32 }
 0x11d   : > { %912 = vmatprep.subr.msk.bf16.mxu0 %vm697_vm9, %v686_v33 }
 0x120   : > { %725 = vmatpush2.bf16.msra.mxu0 %v699_v37 }
 0x121   : > { %726 = vmatprep.subr.bf16.mxu0 %v684_v38 }
 0x124   : > { %727 = vmatpush2.bf16.msra.mxu0 %v683_v7 }
 0x125   : > { %728 = vmatprep.subr.bf16.mxu0 %v682_v43 }
 0x128   : > { %729 = vmatpush2.bf16.msra.mxu0 %v681_v48 }
 0x129   : > { %730 = vmatprep.subr.bf16.mxu0 %v680_v49 }
 0x12c   : > { %731 = vmatpush2.bf16.msra.mxu0 %v679_v54 }
 0x12d   : > { %732 = vmatprep.subr.bf16.mxu0 %v678_v55 }
 0x130   : > { %733 = vmatpush2.bf16.msra.mxu0 %v677_v60 }
 0x131   : > { %734 = vmatprep.subr.bf16.mxu0 %v676_v61 }
 0x134   : > { %735 = vmatpush2.bf16.msra.mxu0 %v675_v0 }
 0x137   : > { %737 = vmatmul.mubr.bf16.vlgmr.msra.gmra.mxu0 %v910_v1 }
 0x1f7   : > { %v738_v10 = vpop.f32.mrf.mxu0 }
 0x1f8   : > { %745 = vst [vmem:[%s1024_s16] sm:$0xff] %v738_v10  ;;  %v759_v12 = vmul.f32 %v752_v8, %v738_v10 }
 0x1f9   : > { %v740_v11 = vpop.f32.mrf.mxu0 }
 0x1fa   : > { %746 = vst [vmem:[%s1024_s16 + $0x8] sm:$0xff] %v740_v11  ;;  %v760_v13 = vmul.f32 %v756_v9, %v740_v11  ;;  %v766_v17 = vmul.f32 %v759_v12, %v738_v10 }
 0x1fb   : > { %v742_v14 = vpop.f32.mrf.mxu0 }
 0x1fc   : > { %v761_v15 = vadd.f32 %v760_v13, %v759_v12  ;;  %v767_v16 = vmul.f32 %v760_v13, %v740_v11 }
 0x1fd   : > { %v743_v6 = vpop.f32.mrf.mxu0 }
 0x1fe   : > { %762 = vadd.xlane.f32.xlu0 %v761_v15  ;;  %v768_v18 = vadd.f32 %v767_v16, %v766_v17 }
 0x202   : > { %769 = vadd.xlane.f32.xlu0 %v768_v18 }
 0x287   : > { %v763_v19 = vpop.xlane.xlu0 %762 }
 0x288   : > { %765 = vst.msk [vmem:[%s1031_s19] sm:$0xff] %vm764_vm10, %v763_v19 }
 0x28b   : > { %v770_v20 = vpop.xlane.xlu0 %769 }
 0x28c   : > { %772 = vst.msk [vmem:[%s1031_s19] sm:$0xff] %vm771_vm11, %v770_v20 }
 0x28d PF: > { %s17_s21 = sadd.s32 1, %s948_s21  }
 0x28e   : > { %p14_p9 = scmp.ge.s32.totalorder %s17_s21, 10  }
 0x290   :  { %16 = sbr.rel (!%p14_p9) target bundleno = 1 (0x1), region = 96 }

</bundles_post_ra>
